<compile_context>
chip_gen: v7x
topology: tpu7x:2x2x1
jax: 0.10.0
libtpu: 0.0.40
codegen_flags: <defaults>
</compile_context>

<pallas_src>
import jax
import jax.numpy as jnp
from jax.experimental import pallas as pl
from jax.experimental.pallas import tpu as pltpu

_NPAD = 128  # lane-padded width of the fused block-diagonal head-weight matrix


def _gated_attention_fusion_kernel(wbig_ref, ovwb_ref, ovflat_ref, h_ref,
                                   mbias_ref, out_ref, att_ref):
    # Per-tile shapes:
    #   wbig_ref  : (n_omics*D, 128)  block-diagonal head weights (f32)
    #   ovwb_ref  : (1, 128)          omic_vec @ w + bias per (head, omic) col
    #   ovflat_ref: (1, n_omics*D)    flattened omic embedding (f32)
    #   h_ref     : (tb, n_omics*D)   flattened features (bf16)
    #   mbias_ref : (tb, n_omics)     additive mask bias (0 or -1e30, bf16)
    #   out_ref   : (tb, D)           fused features (f32)
    #   att_ref   : (tb, n_omics)     attention weights (f32)
    n_omics = att_ref.shape[-1]
    d = out_ref.shape[-1]

    h = h_ref[...].astype(jnp.float32)                     # (tb, n_omics*D)

    # Both Linear(D,1) heads for all omics in one MXU matmul against the
    # block-diagonal weight; omic_vec's logit contribution and the biases are
    # folded into the ovwb row.  Column layout: [head1 x omics | head2 x omics
    # | zero padding to 128 lanes].
    logits = jnp.dot(h, wbig_ref[...],
                     preferred_element_type=jnp.float32) + ovwb_ref[...]
    l1 = logits[:, 0:n_omics]                               # (tb, n_omics)
    l2 = logits[:, n_omics:2 * n_omics]                     # (tb, n_omics)

    att = jax.nn.sigmoid(l1) * jnp.tanh(l2)

    # ex_dict mask, pre-folded into an additive bias (0 present / -1e30 absent).
    # Finite sentinel => rows with every omic masked give finite (uniform)
    # weights instead of the reference's NaN; identical results whenever at
    # least one omic is present (exp underflows to exactly 0).
    att = att + mbias_ref[...].astype(jnp.float32)

    # Softmax over the omic axis (torch dim=1); the divide goes to the EUP via
    # an approximate reciprocal refined by one Newton step (f32-accurate).
    m = jnp.max(att, axis=-1, keepdims=True)
    e = jnp.exp(att - m)
    s = jnp.sum(e, axis=-1, keepdims=True)
    inv = pl.reciprocal(s, approx=True)
    inv = inv * (2.0 - s * inv)
    att = e * inv

    # out = sum_n att_n * (h_n + omic_vec_n): one dense (tb, n_omics*D) add,
    # then n_omics lane-broadcast FMAs over dense 32-lane segments (exact f32).
    hp = h + ovflat_ref[...]
    out = att[:, 0:1] * hp[:, 0:d]
    for n in range(1, n_omics):
        out = out + att[:, n:n + 1] * hp[:, n * d:(n + 1) * d]

    # NOTE: out (32/128 lanes) and att (3/128 lanes) stores are lane-masked;
    # with the bf16 h read dominating HBM traffic this is acceptable.  A bf16
    # out (out_shape dtype change) would halve the remaining write traffic if
    # downstream tolerates it.
    out_ref[...] = out
    att_ref[...] = att


def gated_attention_fusion(h, mask, w, b, omic_vec, *, tb=512):
    """Forward pass of GatedAttentionFusion.

    h:        (B, n_omics, D)  stacked per-omic features (bf16 or f32)
    mask:     (B, n_omics)     stacked existence mask (0/1, f32)
    w:        (2, D)           weights of the two Linear(D, 1) heads
    b:        (1, 2)           their biases
    omic_vec: (n_omics, D)     omic embedding (zeros if omic_embed=False)
    Returns (fused (B, D) f32, att (B, n_omics, 1) f32).
    """
    B, n_omics, D = h.shape
    nd = n_omics * D
    assert 2 * n_omics <= _NPAD

    # Flatten the (n_omics, D) minor dims into one dense last axis (free for a
    # contiguous stack; from the original dict this is just a feature-axis
    # concatenation of the per-omic (B, D) arrays).
    h_flat = h.reshape(B, nd)

    # Pre-fold the existence mask into an additive bf16 bias.
    mask_bias = jnp.where(mask == 0.0, jnp.float32(-1e30),
                          jnp.float32(0.0)).astype(jnp.bfloat16)

    # Batch tile: large enough to amortize the ~0.35us per-grid-step overhead,
    # but always >=2 grid steps (>=4 for big B) so both v7x TensorCores get
    # "parallel" work and the auto-pipeline can overlap DMA with compute.
    tb = min(tb, B)
    if B >= 4 * 128:
        tb = min(tb, max(128, (B // 4) // 8 * 8))
    elif B >= 16:
        tb = min(tb, max(8, (B // 2) // 8 * 8))
    tb = max(8, (tb // 8) * 8)
    n_tiles = pl.cdiv(B, tb)
    B_pad = n_tiles * tb
    if B_pad != B:
        h_flat = jnp.pad(h_flat, ((0, B_pad - B), (0, 0)))
        mask_bias = jnp.pad(mask_bias, ((0, B_pad - B), (0, 0)))

    # Fused head weights: block-diagonal (nd, 128) so a single MXU matmul
    # yields all (head, omic) logits at once.  Column k*n_omics + n holds w[k]
    # in rows n*D:(n+1)*D; ovwb holds omic_vec[n]@w[k] + b[k] per column.
    w32 = w.astype(jnp.float32)
    b32 = b.astype(jnp.float32).reshape(2)
    ov32 = omic_vec.astype(jnp.float32)
    ovw = ov32 @ w32.T                                     # (n_omics, 2)
    wbig = jnp.zeros((nd, _NPAD), jnp.float32)
    ovwb = jnp.zeros((1, _NPAD), jnp.float32)
    for k in range(2):
        for n in range(n_omics):
            col = k * n_omics + n
            wbig = wbig.at[n * D:(n + 1) * D, col].set(w32[k])
            ovwb = ovwb.at[0, col].set(ovw[n, k] + b32[k])
    ovflat = ov32.reshape(1, nd)

    out, att = pl.pallas_call(
        _gated_attention_fusion_kernel,
        out_shape=(
            jax.ShapeDtypeStruct((B_pad, D), jnp.float32),
            jax.ShapeDtypeStruct((B_pad, n_omics), jnp.float32),
        ),
        grid_spec=pltpu.PrefetchScalarGridSpec(
            num_scalar_prefetch=0,
            grid=(n_tiles,),
            in_specs=[
                pl.BlockSpec((nd, _NPAD), lambda i: (0, 0)),        # wbig
                pl.BlockSpec((1, _NPAD), lambda i: (0, 0)),         # ovwb
                pl.BlockSpec((1, nd), lambda i: (0, 0)),            # omic_vec
                pl.BlockSpec((tb, nd), lambda i: (i, 0)),           # h tile
                pl.BlockSpec((tb, n_omics), lambda i: (i, 0)),      # mask bias
            ],
            out_specs=[
                pl.BlockSpec((tb, D), lambda i: (i, 0)),
                pl.BlockSpec((tb, n_omics), lambda i: (i, 0)),
            ],
        ),
        compiler_params=pltpu.CompilerParams(
            dimension_semantics=("parallel",)),
    )(wbig, ovwb, ovflat, h_flat, mask_bias)

    if B_pad != B:
        out = out[:B]
        att = att[:B]
    return out, att[..., None]


def _reference(h, mask, w, b, omic_vec):
    # Pure-f32 reference (elementwise multiply + reduce keeps it exact on TPU
    # regardless of XLA's default matmul precision).
    hh = h.astype(jnp.float32) + omic_vec.astype(jnp.float32)[None]
    w32 = w.astype(jnp.float32)
    l1 = jnp.sum(hh * w32[0][None, None, :], axis=-1) + b[0, 0]
    l2 = jnp.sum(hh * w32[1][None, None, :], axis=-1) + b[0, 1]
    att = jax.nn.sigmoid(l1) * jnp.tanh(l2)
    att = jnp.where(mask == 0.0, -jnp.inf, att)
    att = jax.nn.softmax(att, axis=1)
    out = jnp.sum(att[..., None] * hh, axis=1)
    return out, att[..., None]


if __name__ == "__main__":
    # Small shapes consistent with the module: 3 omics, each with feature dim 32.
    B, n_omics, D = 256, 3, 32

    key = jax.random.PRNGKey(0)
    k_h, k_m, k_w1, k_w2, k_b, k_ov = jax.random.split(key, 6)

    # h_dict analog: n_omics arrays of shape (B, D) stacked along dim=1.
    # bf16 halves the dominant HBM read; the kernel upcasts to f32 internally.
    h_stack = jax.random.normal(
        k_h, (B, n_omics, D), dtype=jnp.float32).astype(jnp.bfloat16)

    # ex_dict analog: 0/1 existence mask; guarantee >=1 live omic per sample
    # (reference would produce NaN for fully-masked rows).
    mask = jax.random.bernoulli(k_m, 0.7, (B, n_omics)).astype(jnp.float32)
    mask = mask.at[:, 0].set(1.0)

    # Parameters: two Linear(D, 1) layers + omic_vec (omic_embed=True path).
    bound = 1.0 / jnp.sqrt(D)
    w = jnp.stack([
        jax.random.uniform(k_w1, (D,), jnp.float32, -bound, bound),
        jax.random.uniform(k_w2, (D,), jnp.float32, -bound, bound),
    ])                                                     # (2, D)
    b = jax.random.uniform(k_b, (1, 2), jnp.float32, -bound, bound)
    omic_vec = jax.random.truncated_normal(
        k_ov, -2.0, 2.0, (n_omics, D), jnp.float32)

    out, att = gated_attention_fusion(h_stack, mask, w, b, omic_vec)
    out = jax.block_until_ready(out)
    att = jax.block_until_ready(att)

    ref_out, ref_att = _reference(h_stack, mask, w, b, omic_vec)
    assert out.shape == (B, D) and att.shape == (B, n_omics, 1)
    # Tolerance leaves headroom for the MXU's multi-pass f32 matmul rounding;
    # in practice the kernel matches the f32 reference to ~1e-6.
    assert jnp.allclose(out, ref_out, rtol=5e-3, atol=5e-3), \
        float(jnp.max(jnp.abs(out - ref_out)))
    assert jnp.allclose(att, ref_att, rtol=5e-3, atol=5e-3), \
        float(jnp.max(jnp.abs(att - ref_att)))

    print("KERNEL_OK")
</pallas_src>

<mosaic_0001>
module attributes {stable_mosaic.version = 11 : i64} {
  func.func @_gated_attention_fusion_kernel(%arg0: i32, %arg1: memref<96x128xf32, #tpu.memory_space<vmem>>, %arg2: memref<1x128xf32, #tpu.memory_space<vmem>>, %arg3: memref<1x96xf32, #tpu.memory_space<vmem>>, %arg4: memref<128x96xbf16, #tpu.memory_space<vmem>>, %arg5: memref<128x3xbf16, #tpu.memory_space<vmem>>, %arg6: memref<128x32xf32, #tpu.memory_space<vmem>>, %arg7: memref<128x3xf32, #tpu.memory_space<vmem>>) attributes {dimension_semantics = [#tpu.dimension_semantics<parallel>], iteration_bounds = array<i64: 2>, scalar_prefetch = 0 : i64, scratch_operands = 0 : i64, tpu.core_type = #tpu.core_type<tc>, window_params = [{pipeline_mode = #tpu.pipeline_mode<synchronous>, transform_indices = @transform_0, window_bounds = array<i64: 96, 128>}, {pipeline_mode = #tpu.pipeline_mode<synchronous>, transform_indices = @transform_1, window_bounds = array<i64: 1, 128>}, {pipeline_mode = #tpu.pipeline_mode<synchronous>, transform_indices = @transform_2, window_bounds = array<i64: 1, 96>}, {transform_indices = @transform_3, window_bounds = array<i64: 128, 96>}, {transform_indices = @transform_4, window_bounds = array<i64: 128, 3>}, {transform_indices = @transform_5, window_bounds = array<i64: 128, 32>}, {transform_indices = @transform_6, window_bounds = array<i64: 128, 3>}]} {
    %c0 = arith.constant 0 : index
    %c0_0 = arith.constant 0 : index
    %0 = vector.load %arg4[%c0, %c0_0] : memref<128x96xbf16, #tpu.memory_space<vmem>>, vector<128x96xbf16>
    %1 = arith.extf %0 : vector<128x96xbf16> to vector<128x96xf32>
    %c0_1 = arith.constant 0 : index
    %c0_2 = arith.constant 0 : index
    %2 = vector.load %arg1[%c0_1, %c0_2] : memref<96x128xf32, #tpu.memory_space<vmem>>, vector<96x128xf32>
    %cst = arith.constant dense<0.000000e+00> : vector<128x128xf32>
    %3 = tpu.matmul %1, %2, %cst {dimension_numbers = #tpu.dot_dimension_numbers<[1], [0], [0], [1], [0, 0, 1, 1], [], []>} : vector<128x96xf32>, vector<96x128xf32>, vector<128x128xf32> -> vector<128x128xf32>
    %c0_3 = arith.constant 0 : index
    %c0_4 = arith.constant 0 : index
    %4 = vector.load %arg2[%c0_3, %c0_4] : memref<1x128xf32, #tpu.memory_space<vmem>>, vector<1x128xf32>
    %5 = vector.broadcast %4 : vector<1x128xf32> to vector<128x128xf32>
    %6 = arith.addf %3, %5 : vector<128x128xf32>
    %7 = vector.extract_strided_slice %6 {offsets = [0, 0], sizes = [128, 3], strides = [1, 1]} : vector<128x128xf32> to vector<128x3xf32>
    %8 = vector.extract_strided_slice %6 {offsets = [0, 3], sizes = [128, 3], strides = [1, 1]} : vector<128x128xf32> to vector<128x3xf32>
    %9 = arith.negf %7 : vector<128x3xf32>
    %10 = math.exp %9 : vector<128x3xf32>
    %cst_5 = arith.constant 1.000000e+00 : f32
    %11 = vector.broadcast %cst_5 : f32 to vector<128x3xf32>
    %12 = arith.addf %11, %10 : vector<128x3xf32>
    %13 = arith.divf %11, %12 : vector<128x3xf32>
    %14 = math.tanh %8 : vector<128x3xf32>
    %15 = arith.mulf %13, %14 : vector<128x3xf32>
    %c0_6 = arith.constant 0 : index
    %c0_7 = arith.constant 0 : index
    %16 = vector.load %arg5[%c0_6, %c0_7] : memref<128x3xbf16, #tpu.memory_space<vmem>>, vector<128x3xbf16>
    %17 = arith.extf %16 : vector<128x3xbf16> to vector<128x3xf32>
    %18 = arith.addf %15, %17 : vector<128x3xf32>
    %cst_8 = arith.constant dense<0xFF800000> : vector<128xf32>
    %19 = vector.multi_reduction <maximumf>, %18, %cst_8 [1] : vector<128x3xf32> to vector<128xf32>
    %20 = vector.shape_cast %19 : vector<128xf32> to vector<128x1xf32>
    %21 = vector.broadcast %20 : vector<128x1xf32> to vector<128x3xf32>
    %22 = arith.subf %18, %21 : vector<128x3xf32>
    %23 = math.exp %22 : vector<128x3xf32>
    %cst_9 = arith.constant dense<0.000000e+00> : vector<128xf32>
    %24 = vector.multi_reduction <add>, %23, %cst_9 [1] : vector<128x3xf32> to vector<128xf32>
    %25 = vector.shape_cast %24 : vector<128xf32> to vector<128x1xf32>
    %26 = tpu.reciprocal %25 {approx = true} : vector<128x1xf32> -> vector<128x1xf32>
    %27 = arith.mulf %25, %26 : vector<128x1xf32>
    %cst_10 = arith.constant 2.000000e+00 : f32
    %28 = vector.broadcast %cst_10 : f32 to vector<128x1xf32>
    %29 = arith.subf %28, %27 : vector<128x1xf32>
    %30 = arith.mulf %26, %29 : vector<128x1xf32>
    %31 = vector.broadcast %30 : vector<128x1xf32> to vector<128x3xf32>
    %32 = arith.mulf %23, %31 : vector<128x3xf32>
    %c0_11 = arith.constant 0 : index
    %c0_12 = arith.constant 0 : index
    %33 = vector.load %arg3[%c0_11, %c0_12] : memref<1x96xf32, #tpu.memory_space<vmem>>, vector<1x96xf32>
    %34 = vector.broadcast %33 : vector<1x96xf32> to vector<128x96xf32>
    %35 = arith.addf %1, %34 : vector<128x96xf32>
    %36 = vector.extract_strided_slice %32 {offsets = [0, 0], sizes = [128, 1], strides = [1, 1]} : vector<128x3xf32> to vector<128x1xf32>
    %37 = vector.extract_strided_slice %35 {offsets = [0, 0], sizes = [128, 32], strides = [1, 1]} : vector<128x96xf32> to vector<128x32xf32>
    %38 = vector.broadcast %36 : vector<128x1xf32> to vector<128x32xf32>
    %39 = arith.mulf %38, %37 : vector<128x32xf32>
    %40 = vector.extract_strided_slice %32 {offsets = [0, 1], sizes = [128, 1], strides = [1, 1]} : vector<128x3xf32> to vector<128x1xf32>
    %41 = vector.extract_strided_slice %35 {offsets = [0, 32], sizes = [128, 32], strides = [1, 1]} : vector<128x96xf32> to vector<128x32xf32>
    %42 = vector.broadcast %40 : vector<128x1xf32> to vector<128x32xf32>
    %43 = arith.mulf %42, %41 : vector<128x32xf32>
    %44 = arith.addf %39, %43 : vector<128x32xf32>
    %45 = vector.extract_strided_slice %32 {offsets = [0, 2], sizes = [128, 1], strides = [1, 1]} : vector<128x3xf32> to vector<128x1xf32>
    %46 = vector.extract_strided_slice %35 {offsets = [0, 64], sizes = [128, 32], strides = [1, 1]} : vector<128x96xf32> to vector<128x32xf32>
    %47 = vector.broadcast %45 : vector<128x1xf32> to vector<128x32xf32>
    %48 = arith.mulf %47, %46 : vector<128x32xf32>
    %49 = arith.addf %44, %48 : vector<128x32xf32>
    %c0_13 = arith.constant 0 : index
    %c0_14 = arith.constant 0 : index
    %50 = vector.load %arg6[%c0_13, %c0_14] : memref<128x32xf32, #tpu.memory_space<vmem>>, vector<128x32xf32>
    tpu.vector_store %arg6[%c0_13, %c0_14], %49 {strides = array<i32>} : memref<128x32xf32, #tpu.memory_space<vmem>>, vector<128x32xf32>,
    %c0_15 = arith.constant 0 : index
    %c0_16 = arith.constant 0 : index
    %51 = vector.load %arg7[%c0_15, %c0_16] : memref<128x3xf32, #tpu.memory_space<vmem>>, vector<128x3xf32>
    tpu.vector_store %arg7[%c0_15, %c0_16], %32 {strides = array<i32>} : memref<128x3xf32, #tpu.memory_space<vmem>>, vector<128x3xf32>,
    return
  }
  func.func @transform_0(%arg0: i32) -> (i32, i32) {
    %c0_i32 = arith.constant 0 : i32
    %c0_i32_0 = arith.constant 0 : i32
    %c0_i32_1 = arith.constant 0 : i32
    return %c0_i32, %c0_i32_0 : i32, i32
  }
  func.func @transform_1(%arg0: i32) -> (i32, i32) {
    %c0_i32 = arith.constant 0 : i32
    %c0_i32_0 = arith.constant 0 : i32
    %c0_i32_1 = arith.constant 0 : i32
    return %c0_i32, %c0_i32_0 : i32, i32
  }
  func.func @transform_2(%arg0: i32) -> (i32, i32) {
    %c0_i32 = arith.constant 0 : i32
    %c0_i32_0 = arith.constant 0 : i32
    %c0_i32_1 = arith.constant 0 : i32
    return %c0_i32, %c0_i32_0 : i32, i32
  }
  func.func @transform_3(%arg0: i32) -> (i32, i32) {
    %c0_i32 = arith.constant 0 : i32
    %c0_i32_0 = arith.constant 0 : i32
    return %arg0, %c0_i32 : i32, i32
  }
  func.func @transform_4(%arg0: i32) -> (i32, i32) {
    %c0_i32 = arith.constant 0 : i32
    %c0_i32_0 = arith.constant 0 : i32
    return %arg0, %c0_i32 : i32, i32
  }
  func.func @transform_5(%arg0: i32) -> (i32, i32) {
    %c0_i32 = arith.constant 0 : i32
    %c0_i32_0 = arith.constant 0 : i32
    return %arg0, %c0_i32 : i32, i32
  }
  func.func @transform_6(%arg0: i32) -> (i32, i32) {
    %c0_i32 = arith.constant 0 : i32
    %c0_i32_0 = arith.constant 0 : i32
    return %arg0, %c0_i32 : i32, i32
  }
}

</mosaic_0001>

<bundles_post_ra>
// kernel: tpu_custom_call.1
= control target key start
LH: loop header
LB: loop body
LE: loop exit
PB: predicated region body
PF: predicated region fallthrough
CT: control target
= control target key end

     0   :  { %s2067_s21 = smov 0   ;;  %s2788_s0 = inlined_call_operand.vmem [shape: f32[96,128], index: 0, kind: input, shape index: {}]   ;;  %s2789_s1 = inlined_call_operand.vmem [shape: f32[1,128], index: 1, kind: input, shape index: {}]   ;;  %s2790_s2 = inlined_call_operand.vmem [shape: f32[1,96], index: 2, kind: input, shape index: {}]   ;;  %s2791_s3 = inlined_call_operand.vmem [shape: bf16[256,96], index: 3, kind: input, shape index: {}]   ;;  %s2792_s4 = inlined_call_operand.vmem [shape: bf16[256,3], index: 4, kind: input, shape index: {}]   ;;  %s2793_s5 = inlined_call_operand.vmem [shape: f32[256,32], index: 5, kind: output, shape index: {0}]   ;;  %s2794_s6 = inlined_call_operand.vmem [shape: f32[256,3], index: 6, kind: output, shape index: {1}]  }
   0x1 LB: > { %s1575_s22 = sadd.s32 4294967295, %s2024_s21   ;;  %p1579_p0 = scmp.ge.s32.totalorder %s2024_s21, 1  ;;  %s2024_s21 = sphi %s2067_s21, %s17_s21  }
   0x2   : > { %p227_p1 = scmp.lt.s32.totalorder %s2024_s21, 3 }
   0x4   : > { %p228_p2 = pnand %p1579_p0, %p227_p1 }
   0x5   : > { %v323_v0 = vld [vmem:[%s2788_s0] sm:$0xff] (!%p228_p2)  ;;  %v324_v1 = vld [vmem:[%s2788_s0 + $0x8] sm:$0xff] (!%p228_p2)  ;;  %v325_v2 = vld [vmem:[%s2788_s0 + $0x10] sm:$0xff] (!%p228_p2)  ;;  %s1580_s29 = sshll.u32 (!%p228_p2), %s1575_s22, 4  ;;  %vm342_vm0 = vcmask (!%p228_p2), 785408   ;;  %s2026_s8 = smov (!%p228_p2), 125  }
   0x6   : > { %231 = sbr.rel (%p228_p2) target bundleno = 1070 (0x42e), region = 40  ;;  %v1778_v3 = vpack.c.bf16 (!%p228_p2), %v324_v1, %v323_v0  ;;  %v326_v4 = vld [vmem:[%s2788_s0 + $0x18] sm:$0xff] (!%p228_p2)  ;;  %p268_p3 = scmp.lt.s32.totalorder (!%p228_p2), %s1580_s29, 31  ;;  %v327_v6 = vld [vmem:[%s2788_s0 + $0x20] sm:$0xff] (!%p228_p2)  ;;  %v328_v7 = vld [vmem:[%s2788_s0 + $0x28] sm:$0xff] (!%p228_p2)  ;;  %vm776_vm1 = vcmask (!%p228_p2), 23552  }
   0x7   : > { %v1782_v5 = vpack.c.bf16 (!%p228_p2), %v326_v4, %v325_v2  ;;  %v1786_v8 = vpack.c.bf16 (!%p228_p2), %v328_v7, %v327_v6  ;;  %v329_v9 = vld [vmem:[%s2788_s0 + $0x30] sm:$0xff] (!%p228_p2)  ;;  %v330_v10 = vld [vmem:[%s2788_s0 + $0x38] sm:$0xff] (!%p228_p2)  ;;  %v331_v16 = vld [vmem:[%s2788_s0 + $0x40] sm:$0xff] (!%p228_p2)  ;;  %s2030_s18 = smov (!%p228_p2), 96   ;;  %vm1440_vm2 = vcmask (!%p228_p2), 261120  }
   0x8   : > { %1779 = vmatprep.subr.bf16.mxu0 (!%p228_p2), %v1778_v3  ;;  %1802 = vmatprep.subr.bf16.mxu1 (!%p228_p2), %v1778_v3  ;;  %v1790_v15 = vpack.c.bf16 (!%p228_p2), %v330_v10, %v329_v9  ;;  %v332_v17 = vld [vmem:[%s2788_s0 + $0x48] sm:$0xff] (!%p228_p2)  ;;  %v333_v19 = vld [vmem:[%s2788_s0 + $0x50] sm:$0xff] (!%p228_p2)  ;;  %v334_v20 = vld [vmem:[%s2788_s0 + $0x58] sm:$0xff] (!%p228_p2) }
   0x9   : > { %1781 = vmatpush3.bf16.msra.mxu0 (!%p228_p2), %v1778_v3  ;;  %1808 = vmatpush3.bf16.msra.mxu1 (!%p228_p2), %v1778_v3  ;;  %v1794_v18 = vpack.c.bf16 (!%p228_p2), %v332_v17, %v331_v16  ;;  %v1798_v21 = vpack.c.bf16 (!%p228_p2), %v334_v20, %v333_v19  ;;  %v2212_v42 = vld [vmem:[%s2789_s1] ss:$0 sm:$0xff] (!%p228_p2) }
   0xa   : > { %1783 = vmatprep.subr.bf16.mxu0 (!%p228_p2), %v1782_v5  ;;  %1803 = vmatprep.subr.bf16.mxu1 (!%p228_p2), %v1782_v5 }
   0xd   : > { %s2796_s29 = smov (!%p268_p3, %s1580_s29), 31  ;;  %1785 = vmatpush3.bf16.msra.mxu0 %v1782_v5  ;;  %1809 = vmatpush3.bf16.msra.mxu1 %v1782_v5 }
   0xe   : > { %s1581_s12 = sshll.u32 %s2796_s29, 2  ;;  %1787 = vmatprep.subr.bf16.mxu0 %v1786_v8  ;;  %1804 = vmatprep.subr.bf16.mxu1 %v1786_v8 }
   0xf   : > { %s2107_s19 = scalar_lea.vmem %s2791_s3, %s1581_s12  ;;  %s2304_s11 = scalar_lea.vmem %s2792_s4, %s1581_s12 }
  0x10   : > { %v2110_v11 = vld [vmem:[%s2107_s19] sm:$0xff]   ;;  %v2136_v22 = vld [vmem:[%s2107_s19 + $0x8] sm:$0xff]   ;;  %v2146_v28 = vld [vmem:[%s2107_s19 + $0x10] sm:$0xff]   ;;  %s1585_s12 = sshll.u32 %s2796_s29, 3 }
  0x11   : > { %v2113_v12 = vld [vmem:[%s2107_s19 + $0x20] sm:$0xff]   ;;  %v1626_v13 = vunpack.c.l.bf16 %v2110_v11  ;;  %1789 = vmatpush3.bf16.msra.mxu0 %v1786_v8  ;;  %1810 = vmatpush3.bf16.msra.mxu1 %v1786_v8  ;;  %v2139_v23 = vld [vmem:[%s2107_s19 + $0x28] sm:$0xff]   ;;  %v1627_v24 = vunpack.c.h.bf16 %v2110_v11  ;;  %v1630_v26 = vunpack.c.l.bf16 %v2136_v22  ;;  %v2149_v29 = vld [vmem:[%s2107_s19 + $0x30] sm:$0xff]   ;;  %v1631_v30 = vunpack.c.h.bf16 %v2136_v22  ;;  %s2481_s15 = scalar_lea.vmem %s2794_s6, %s1585_s12  ;;  %s2736_s23 = scalar_lea.vmem %s2793_s5, %s1585_s12 }
  0x12   : > { %v1642_v14 = vunpack.c.l.bf16 %v2113_v12  ;;  %1791 = vmatprep.subr.bf16.mxu0 %v1790_v15  ;;  %1805 = vmatprep.subr.bf16.mxu1 %v1790_v15  ;;  %v1643_v25 = vunpack.c.h.bf16 %v2113_v12  ;;  %v1646_v27 = vunpack.c.l.bf16 %v2139_v23  ;;  %v1647_v31 = vunpack.c.h.bf16 %v2139_v23  ;;  %v2168_v34 = vld [vmem:[%s2107_s19 + $0x18] sm:$0xff]  }
  0x13   : > { %1754 = vmatprep.mubr.msk.f32.mxu0 %vm342_vm0, %v1626_v13  ;;  %v1634_v32 = vunpack.c.l.bf16 %v2146_v28  ;;  %v1650_v33 = vunpack.c.l.bf16 %v2149_v29  ;;  %v2171_v35 = vld [vmem:[%s2107_s19 + $0x38] sm:$0xff]   ;;  %v1635_v36 = vunpack.c.h.bf16 %v2146_v28  ;;  %v1651_v37 = vunpack.c.h.bf16 %v2149_v29  ;;  %s2031_s19 = smov 64  }
  0x14   : > { %1766 = vmatprep.mubr.msk.f32.mxu1 %vm342_vm0, %v1642_v14  ;;  %v1638_v38 = vunpack.c.l.bf16 %v2168_v34  ;;  %v1654_v39 = vunpack.c.l.bf16 %v2171_v35  ;;  %v1639_v40 = vunpack.c.h.bf16 %v2168_v34  ;;  %v1655_v41 = vunpack.c.h.bf16 %v2171_v35 }
  0x15   : > { %1793 = vmatpush3.bf16.msra.mxu0 %v1790_v15  ;;  %1811 = vmatpush3.bf16.msra.mxu1 %v1790_v15 }
  0x16   : > { %1795 = vmatprep.subr.bf16.mxu0 %v1794_v18  ;;  %1806 = vmatprep.subr.bf16.mxu1 %v1794_v18 }
  0x19   : > { %1797 = vmatpush3.bf16.msra.mxu0 %v1794_v18  ;;  %1812 = vmatpush3.bf16.msra.mxu1 %v1794_v18 }
  0x1a   : > { %1799 = vmatprep.subr.bf16.mxu0 %v1798_v21  ;;  %1807 = vmatprep.subr.bf16.mxu1 %v1798_v21 }
  0x1d   : > { %1801 = vmatpush3.bf16.msra.mxu0 %v1798_v21  ;;  %1813 = vmatpush3.bf16.msra.mxu1 %v1798_v21 }
  0x20   : > { %1755 = vmatmul.mubr.msk.f32.vlgmr.msra.gmra.mrb[0].mxu0 %vm342_vm0, %v1627_v24  ;;  %1767 = vmatmul.mubr.msk.f32.vlgmr.msra.gmra.mrb[0].mxu1 %vm342_vm0, %v1643_v25 }
  0x21   : > { %1757 = vmatprep.mubr.msk.f32.mxu0 %vm342_vm0, %v1630_v26  ;;  %1769 = vmatprep.mubr.msk.f32.mxu1 %vm342_vm0, %v1646_v27 }
  0x24   : > { %1758 = vmatmul.mubr.msk.f32.gmra.mrb[2].mxu0 %vm342_vm0, %v1631_v30  ;;  %1770 = vmatmul.mubr.msk.f32.gmra.mrb[2].mxu1 %vm342_vm0, %v1647_v31 }
  0x25   : > { %1760 = vmatprep.mubr.msk.f32.mxu0 %vm342_vm0, %v1634_v32  ;;  %1772 = vmatprep.mubr.msk.f32.mxu1 %vm342_vm0, %v1650_v33 }
  0x28   : > { %1761 = vmatmul.mubr.msk.f32.gmra.mrb[4].mxu0 %vm342_vm0, %v1635_v36  ;;  %1773 = vmatmul.mubr.msk.f32.gmra.mrb[4].mxu1 %vm342_vm0, %v1651_v37 }
  0x29   : > { %1763 = vmatprep.mubr.msk.f32.mxu0 %vm342_vm0, %v1638_v38  ;;  %1775 = vmatprep.mubr.msk.f32.mxu1 %vm342_vm0, %v1654_v39 }
  0x2c   : > { %1764 = vmatmul.mubr.msk.f32.gmra.mrb[6].mxu0 %vm342_vm0, %v1639_v40  ;;  %1776 = vmatmul.mubr.msk.f32.gmra.mrb[6].mxu1 %vm342_vm0, %v1655_v41 }
  0xf3   : > { %v1756_v43 = vpop.f32.mrb[0].mxu0  ;;  %v1768_v44 = vpop.f32.mrb[0].mxu1 }
  0xf4   : > { %v2215_v45 = vadd.f32 %v1756_v43, %v2212_v42  ;;  %v2218_v46 = vadd.f32 %v1768_v44, %v2212_v42  ;;  %v457_v47 = vpop.f32.mrb[1].mxu0  ;;  %v497_v48 = vpop.f32.mrb[1].mxu1 }
  0xf5   : > { %v2223_v49 = vadd.f32 %v2212_v42, %v457_v47  ;;  %v2230_v55 = vadd.f32 %v2212_v42, %v497_v48 }
  0xf6   : > { %1858 = vtanh.f32 %v2215_v45 }
  0xf7   : > { %1860 = vtanh.f32 %v2218_v46  ;;  %v1759_v50 = vpop.f32.mrb[2].mxu0  ;;  %v1771_v51 = vpop.f32.mrb[2].mxu1 }
  0xf8   : > { %v467_v52 = vpop.f32.mrb[3].mxu0  ;;  %v507_v53 = vpop.f32.mrb[3].mxu1  ;;  %v2226_v54 = vadd.f32 %v1759_v50, %v2212_v42  ;;  %1862 = vtanh.f32 %v2223_v49  ;;  %v2234_v60 = vadd.f32 %v1771_v51, %v2212_v42 }
  0xf9   : > { %v2238_v61 = vadd.f32 %v2212_v42, %v467_v52  ;;  %v508_v4 = vadd.f32 %v2212_v42, %v507_v53 }
  0xfa   : > { %1864 = vtanh.f32 %v2226_v54 }
  0xfb   : > { %v1762_v56 = vpop.f32.mrb[4].mxu0  ;;  %v1774_v57 = vpop.f32.mrb[4].mxu1  ;;  %1866 = vtanh.f32 %v2230_v55 }
  0xfc   : > { %v477_v58 = vpop.f32.mrb[5].mxu0  ;;  %v517_v59 = vpop.f32.mrb[5].mxu1  ;;  %1868 = vtanh.f32 %v2234_v60  ;;  %v2247_v7 = vadd.f32 %v1762_v56, %v2212_v42  ;;  %v2257_v16 = vadd.f32 %v1774_v57, %v2212_v42  ;;  %v1606_v56 = vmul.f32 -1.442695, %v2215_v45 }
  0xfd   : > { %1870 = vtanh.f32 %v2238_v61  ;;  %v2253_v10 = vadd.f32 %v2212_v42, %v477_v58  ;;  %v2262_v17 = vadd.f32 %v2212_v42, %v517_v59  ;;  %v1614_v57 = vmul.f32 -1.442695, %v2218_v46 }
  0xfe   : > { %1872 = vtanh.f32 %v508_v4  ;;  %v1605_v58 = vmul.f32 -1.442695, %v2223_v49  ;;  %v1608_v59 = vmul.f32 -1.442695, %v2226_v54  ;;  %v1607_v45 = vmul.f32 -1.442695, %v2238_v61 }
  0xff   : > { %v1765_v62 = vpop.f32.mrb[6].mxu0  ;;  %v1777_v63 = vpop.f32.mrb[6].mxu1  ;;  %1874 = vtanh.f32 %v2247_v7  ;;  %v1615_v46 = vmul.f32 -1.442695, %v508_v4  ;;  %v1610_v54 = vmul.f32 -1.442695, %v2247_v7 }
 0x100   : > { %v1859_v0 = vpop.eup %1858  ;;  %v487_v1 = vpop.f32.mrb[7].mxu0  ;;  %1876 = vtanh.f32 %v2253_v10  ;;  %v2267_v19 = vadd.f32 %v1765_v62, %v2212_v42  ;;  %v2276_v43 = vadd.f32 %v1777_v63, %v2212_v42  ;;  %v1613_v62 = vmul.f32 -1.442695, %v2230_v55 }
 0x101   : > { %v527_v2 = vpop.f32.mrb[7].mxu1  ;;  %v1861_v3 = vpop.eup %1860  ;;  %666 = vrot.lane.b32.xlu0 %v1859_v0, %s2026_s8  ;;  %1878 = vtanh.f32 %v2257_v16  ;;  %v2271_v21 = vadd.f32 %v2212_v42, %v487_v1  ;;  %v1616_v63 = vmul.f32 -1.442695, %v2234_v60 }
 0x102   : > { %682 = vrot.lane.b32.xlu1 %v1861_v3, %s2026_s8  ;;  %v1863_v5 = vpop.eup %1862  ;;  %1880 = vtanh.f32 %v2262_v17  ;;  %v2281_v47 = vadd.f32 %v2212_v42, %v527_v2 }
 0x103   : > { %1882 = vtanh.f32 %v2267_v19 }
 0x104   : > { %v1865_v6 = vpop.eup %1864  ;;  %1884 = vtanh.f32 %v2271_v21 }
 0x105   : > { %664 = vrot.lane.b32.xlu0 %v1863_v5, %s2026_s8  ;;  %v1867_v8 = vpop.eup %1866  ;;  %1886 = vtanh.f32 %v2276_v43 }
 0x106   : > { %670 = vrot.lane.b32.xlu1 %v1865_v6, %s2026_s8  ;;  %v1869_v9 = vpop.eup %1868  ;;  %1888 = vtanh.f32 %v2281_v47 }
 0x107   : > { %v1871_v15 = vpop.eup %1870  ;;  %1890 = vpow2.f32 %v1606_v56 }
 0x108   : > { %v1873_v18 = vpop.eup %1872  ;;  %1892 = vpow2.f32 %v1614_v57 }
 0x109   : > { %680 = vrot.lane.b32.xlu0 %v1867_v8, %s2026_s8  ;;  %v1875_v20 = vpop.eup %1874  ;;  %1894 = vpow2.f32 %v1605_v58  ;;  %v1609_v8 = vmul.f32 -1.442695, %v2253_v10 }
 0x10a   : > { %686 = vrot.lane.b32.xlu1 %v1869_v9, %s2026_s8  ;;  %v1877_v44 = vpop.eup %1876  ;;  %1896 = vpow2.f32 %v1608_v59  ;;  %v1657_v9 = vld [vmem:[%s2304_s11] sm:$0xff]  }
 0x10b   : > { %v1879_v48 = vpop.eup %1878  ;;  %1898 = vpow2.f32 %v1613_v62  ;;  %v2318_v62 = vld [vmem:[%s2304_s11 + $0x8] sm:$0xff]  }
 0x10c   : > { %v1881_v50 = vpop.eup %1880  ;;  %1900 = vpow2.f32 %v1616_v63 }
 0x10d   : > { %684 = vrot.lane.b32.xlu0 %v1873_v18, %s2026_s8  ;;  %v1883_v51 = vpop.eup %1882  ;;  %1902 = vpow2.f32 %v1607_v45 }
 0x10e   : > { %668 = vrot.lane.b32.xlu1 %v1871_v15, %s2026_s8  ;;  %v1885_v52 = vpop.eup %1884  ;;  %1904 = vpow2.f32 %v1615_v46  ;;  %v2309_v15 = vld [vmem:[%s2304_s11 + $0x20] sm:$0xff]   ;;  %v1611_v46 = vmul.f32 -1.442695, %v2271_v21 }
 0x10f   : > { %v1887_v53 = vpop.eup %1886 }
 0x110   : > { %v1889_v42 = vpop.eup %1888 }
 0x111   : > { %672 = vrot.lane.b32.xlu0 %v1877_v44, %s2026_s8  ;;  %v1891_v0 = vpop.eup %1890 }
 0x112   : > { %674 = vrot.lane.b32.xlu1 %v1875_v20, %s2026_s8  ;;  %v1893_v1 = vpop.eup %1892  ;;  %v585_v2 = vadd.f32 1.0, %v1891_v0  ;;  %v1618_v20 = vmul.f32 -1.442695, %v2257_v16  ;;  %v1612_v16 = vmul.f32 -1.442695, %v2267_v19 }
 0x113   : > { %v593_v3 = vadd.f32 1.0, %v1893_v1  ;;  %v1895_v5 = vpop.eup %1894  ;;  %v1658_v1 = vunpack.c.l.bf16 %v1657_v9 }
 0x114   : > { %v1897_v49 = vpop.eup %1896  ;;  %1906 = vrcp.f32 %v585_v2  ;;  %v584_v60 = vadd.f32 1.0, %v1895_v5 }
 0x115   : > { %688 = vrot.lane.b32.xlu0 %v1881_v50, %s2026_s8  ;;  %v1899_v55 = vpop.eup %1898  ;;  %1908 = vrcp.f32 %v593_v3  ;;  %v587_v61 = vadd.f32 1.0, %v1897_v49  ;;  %v1663_v49 = vunpack.c.h.bf16 %v2318_v62 }
 0x116   : > { %690 = vrot.lane.b32.xlu1 %v1879_v48, %s2026_s8  ;;  %v1901_v4 = vpop.eup %1900  ;;  %v592_v6 = vadd.f32 1.0, %v1899_v55  ;;  %1910 = vpow2.f32 %v1610_v54  ;;  %v1659_v48 = vunpack.c.h.bf16 %v1657_v9  ;;  %v1674_v9 = vunpack.c.l.bf16 %v2309_v15 }
 0x117   : > { %1912 = vrcp.f32 %v584_v60  ;;  %v595_v7 = vadd.f32 1.0, %v1901_v4  ;;  %v1903_v18 = vpop.eup %1902  ;;  %v1620_v60 = vmul.f32 -1.442695, %v2276_v43  ;;  %v1699_v4 = vld [vmem:[%s2304_s11 + $0x28] sm:$0xff]  }
 0x118   : > { %1914 = vrcp.f32 %v587_v61  ;;  %v1905_v44 = vpop.eup %1904  ;;  %v1679_v43 = vunpack.c.h.bf16 %v1699_v4 }
 0x119   : > { %676 = vrot.lane.b32.xlu0 %v1885_v52, %s2026_s8  ;;  %1916 = vrcp.f32 %v592_v6  ;;  %v594_v0 = vadd.f32 1.0, %v1905_v44 }
 0x11a   : > { %678 = vrot.lane.b32.xlu1 %v1883_v51, %s2026_s8  ;;  %1918 = vpow2.f32 %v1609_v8  ;;  %v1617_v51 = vmul.f32 -1.442695, %v2262_v17 }
 0x11b   : > { %1920 = vrcp.f32 %v595_v7 }
 0x11c   : > { %1922 = vpow2.f32 %v1618_v20 }
 0x11d   : > { %692 = vrot.lane.b32.xlu0 %v1889_v42, %s2026_s8  ;;  %v586_v42 = vadd.f32 1.0, %v1903_v18  ;;  %1924 = vpow2.f32 %v1617_v51  ;;  %v1619_v51 = vmul.f32 -1.442695, %v2281_v47  ;;  %v1662_v47 = vunpack.c.l.bf16 %v2318_v62 }
 0x11e   : > { %694 = vrot.lane.b32.xlu1 %v1887_v53, %s2026_s8  ;;  %v1907_v50 = vpop.eup %1906  ;;  %v1675_v53 = vunpack.c.h.bf16 %v2309_v15 }
 0x11f   : > { %v1909_v10 = vpop.eup %1908  ;;  %1926 = vrcp.f32 %v586_v42 }
 0x120   : > { %v1911_v63 = vpop.eup %1910  ;;  %1928 = vpow2.f32 %v1612_v16 }
 0x121   : > { %v1913_v45 = vpop.eup %1912  ;;  %v589_v55 = vadd.f32 1.0, %v1911_v63  ;;  %1930 = vrcp.f32 %v594_v0 }
 0x122   : > { %v1915_v54 = vpop.eup %1914  ;;  %1932 = vpow2.f32 %v1611_v46 }
 0x123   : > { %v1917_v21 = vpop.eup %1916  ;;  %1934 = vrcp.f32 %v589_v55 }
 0x124   : > { %v1919_v7 = vpop.eup %1918  ;;  %1936 = vpow2.f32 %v1620_v60 }
 0x125   : > { %1938 = vpow2.f32 %v1619_v51 }
 0x173   : > { %v667_v52 = vpop.permute.xlu0 %666 }
 0x174   : > { %v683_v56 = vpop.permute.xlu1 %682  ;;  %v713_v57 = vmul.f32 %v1907_v50, %v667_v52  ;;  %v1921_v50 = vpop.eup %1920 }
 0x175   : > { %v721_v58 = vmul.f32 %v1909_v10, %v683_v56  ;;  %v588_v10 = vadd.f32 1.0, %v1919_v7 }
 0x176   : > { %v2315_v59 = vadd.f32 %v1659_v48, %v713_v57 }
 0x177   : > { %v2320_v17 = vadd.f32 %v1675_v53, %v721_v58  ;;  %v665_v2 = vpop.permute.xlu0 %664  ;;  %v1923_v53 = vpop.eup %1922  ;;  %1940 = vrcp.f32 %v588_v10 }
 0x178   : > { %v780_v3 = vsel %vm776_vm1, %v2315_v59, -inf  ;;  %v712_v19 = vmul.f32 %v1913_v45, %v665_v2  ;;  %v671_v61 = vpop.permute.xlu1 %670  ;;  %v1925_v56 = vpop.eup %1924  ;;  %v597_v0 = vadd.f32 1.0, %v1923_v53  ;;  %v1700_v53 = vld [vmem:[%s2304_s11 + $0x30] sm:$0xff]  }
 0x179   : > { %781 = vmax.xlane.f32.xlu1 %v780_v3  ;;  %v804_v5 = vsel %vm776_vm1, %v2320_v17, -inf  ;;  %v715_v6 = vmul.f32 %v1915_v54, %v671_v61  ;;  %v1927_v63 = vpop.eup %1926  ;;  %v596_v2 = vadd.f32 1.0, %v1925_v56  ;;  %v1678_v3 = vunpack.c.l.bf16 %v1699_v4  ;;  %v1696_v54 = vld [vmem:[%s2304_s11 + $0x10] sm:$0xff]  }
 0x17a   : > { %805 = vmax.xlane.f32.xlu0 %v804_v5  ;;  %v2330_v8 = vadd.f32 %v1658_v1, %v712_v19  ;;  %v1929_v46 = vpop.eup %1928  ;;  %1942 = vrcp.f32 %v597_v0 }
 0x17b   : > { %v681_v18 = vpop.permute.xlu0 %680  ;;  %v2335_v48 = vadd.f32 %v1663_v49, %v715_v6  ;;  %v1931_v19 = vpop.eup %1930  ;;  %v591_v61 = vadd.f32 1.0, %v1929_v46  ;;  %1944 = vrcp.f32 %v596_v2  ;;  %v1682_v2 = vunpack.c.l.bf16 %v1700_v53 }
 0x17c   : > { %v720_v20 = vmul.f32 %v1917_v21, %v681_v18  ;;  %v777_v44 = vsel %vm776_vm1, %v2330_v8, -inf  ;;  %v687_v52 = vpop.permute.xlu1 %686  ;;  %v1933_v62 = vpop.eup %1932 }
 0x17d   : > { %v723_v15 = vmul.f32 %v1921_v50, %v687_v52  ;;  %v786_v58 = vsel %vm776_vm1, %v2335_v48, -inf  ;;  %v1935_v21 = vpop.eup %1934  ;;  %v590_v7 = vadd.f32 1.0, %v1933_v62  ;;  %1946 = vrcp.f32 %v591_v61 }
 0x17e   : > { %778 = vmax.xlane.f32.xlu0 %v777_v44  ;;  %v2338_v42 = vadd.f32 %v1674_v9, %v720_v20  ;;  %v1667_v9 = vunpack.c.h.bf16 %v1696_v54  ;;  %v1937_v4 = vpop.eup %1936  ;;  %v1666_v52 = vunpack.c.l.bf16 %v1696_v54 }
 0x17f   : > { %v2344_v16 = vadd.f32 %v1679_v43, %v723_v15  ;;  %v685_v5 = vpop.permute.xlu0 %684  ;;  %v1939_v50 = vpop.eup %1938  ;;  %v599_v51 = vadd.f32 1.0, %v1937_v4  ;;  %1948 = vrcp.f32 %v590_v7 }
 0x180   : > { %v801_v57 = vsel %vm776_vm1, %v2338_v42, -inf  ;;  %v669_v1 = vpop.permute.xlu1 %668  ;;  %v722_v60 = vmul.f32 %v1931_v19, %v685_v5 }
 0x181   : > { %802 = vmax.xlane.f32.xlu1 %v801_v57  ;;  %v714_v45 = vmul.f32 %v1927_v63, %v669_v1  ;;  %v810_v49 = vsel %vm776_vm1, %v2344_v16, -inf  ;;  %v1941_v15 = vpop.eup %1940  ;;  %v1683_v63 = vunpack.c.h.bf16 %v1700_v53  ;;  %1950 = vrcp.f32 %v599_v51 }
 0x182   : > { %787 = vmax.xlane.f32.xlu0 %v786_v58  ;;  %v2352_v6 = vadd.f32 %v1678_v3, %v722_v60  ;;  %v1697_v3 = vld [vmem:[%s2304_s11 + $0x18] sm:$0xff]  }
 0x183   : > { %v2350_v55 = vadd.f32 %v1662_v47, %v714_v45  ;;  %v673_v56 = vpop.permute.xlu0 %672  ;;  %v598_v47 = vadd.f32 1.0, %v1939_v50  ;;  %v1671_v60 = vunpack.c.h.bf16 %v1697_v3 }
 0x184   : > { %v675_v18 = vpop.permute.xlu1 %674  ;;  %v807_v43 = vsel %vm776_vm1, %v2352_v6, -inf  ;;  %v716_v57 = vmul.f32 %v1941_v15, %v673_v56  ;;  %v1943_v0 = vpop.eup %1942 }
 0x185   : > { %v783_v20 = vsel %vm776_vm1, %v2350_v55, -inf  ;;  %v717_v44 = vmul.f32 %v1935_v21, %v675_v18  ;;  %808 = vmax.xlane.f32.xlu1 %v807_v43  ;;  %v1945_v19 = vpop.eup %1944  ;;  %1952 = vrcp.f32 %v598_v47  ;;  %v1670_v18 = vunpack.c.l.bf16 %v1697_v3 }
 0x186   : > { %811 = vmax.xlane.f32.xlu0 %v810_v49  ;;  %v2363_v45 = vadd.f32 %v1666_v52, %v716_v57 }
 0x187   : > { %v2359_v10 = vadd.f32 %v1667_v9, %v717_v44  ;;  %v689_v5 = vpop.permute.xlu0 %688  ;;  %v1947_v61 = vpop.eup %1946 }
 0x188   : > { %v691_v1 = vpop.permute.xlu1 %690  ;;  %v789_v49 = vsel %vm776_vm1, %v2363_v45, -inf  ;;  %v724_v54 = vmul.f32 %v1945_v19, %v689_v5 }
 0x189   : > { %v792_v58 = vsel %vm776_vm1, %v2359_v10, -inf  ;;  %v725_v46 = vmul.f32 %v1943_v0, %v691_v1  ;;  %790 = vmax.xlane.f32.xlu1 %v789_v49  ;;  %v1949_v44 = vpop.eup %1948 }
 0x18a   : > { %784 = vmax.xlane.f32.xlu0 %v783_v20  ;;  %v2370_v9 = vadd.f32 %v1682_v2, %v724_v54  ;;  %v1701_v20 = vld [vmem:[%s2304_s11 + $0x38] sm:$0xff]  }
 0x18b   : > { %v2368_v62 = vadd.f32 %v1683_v63, %v725_v46  ;;  %v677_v43 = vpop.permute.xlu0 %676  ;;  %v1687_v53 = vunpack.c.h.bf16 %v1701_v20  ;;  %v1951_v15 = vpop.eup %1950  ;;  %v1686_v0 = vunpack.c.l.bf16 %v1701_v20 }
 0x18c   : > { %v679_v21 = vpop.permute.xlu1 %678  ;;  %v813_v50 = vsel %vm776_vm1, %v2370_v9, -inf  ;;  %v718_v51 = vmul.f32 %v1949_v44, %v677_v43 }
 0x18d   : > { %v816_v4 = vsel %vm776_vm1, %v2368_v62, -inf  ;;  %v719_v7 = vmul.f32 %v1947_v61, %v679_v21  ;;  %814 = vmax.xlane.f32.xlu1 %v813_v50 }
 0x18e   : > { %793 = vmax.xlane.f32.xlu0 %v792_v58  ;;  %v2379_v57 = vadd.f32 %v1670_v18, %v718_v51 }
 0x18f   : > { %v2377_v52 = vadd.f32 %v1671_v60, %v719_v7  ;;  %v1953_v1 = vpop.eup %1952  ;;  %v693_v46 = vpop.permute.xlu0 %692 }
 0x190   : > { %v695_v56 = vpop.permute.xlu1 %694  ;;  %v795_v63 = vsel %vm776_vm1, %v2379_v57, -inf  ;;  %v726_v3 = vmul.f32 %v1953_v1, %v693_v46 }
 0x191   : > { %v798_v58 = vsel %vm776_vm1, %v2377_v52, -inf  ;;  %v727_v47 = vmul.f32 %v1951_v15, %v695_v56  ;;  %796 = vmax.xlane.f32.xlu1 %v795_v63 }
 0x192   : > { %817 = vmax.xlane.f32.xlu0 %v816_v4  ;;  %v2389_v5 = vadd.f32 %v1686_v0, %v726_v3 }
 0x193   : > { %v2385_v2 = vadd.f32 %v1687_v53, %v727_v47 }
 0x194   : > { %v819_v49 = vsel %vm776_vm1, %v2389_v5, -inf }
 0x195   : > { %v822_v19 = vsel %vm776_vm1, %v2385_v2, -inf  ;;  %820 = vmax.xlane.f32.xlu1 %v819_v49 }
 0x196   : > { %799 = vmax.xlane.f32.xlu0 %v798_v58 }
 0x19a   : > { %823 = vmax.xlane.f32.xlu0 %v822_v19 }
 0x206   : > { %v782_v54 = vpop.xlane.xlu1 %781 }
 0x207   : > { %v826_v60 = vsub.f32 %v2315_v59, %v782_v54  ;;  %v806_v61 = vpop.xlane.xlu0 %805 }
 0x208   : > { %v834_v21 = vsub.f32 %v2320_v17, %v806_v61 }
 0x209   : > { %v843_v4 = vmul.f32 1.442695, %v826_v60 }
 0x20a   : > { %v859_v7 = vmul.f32 1.442695, %v834_v21 }
 0x20b   : > { %1954 = vpow2.f32 %v843_v4  ;;  %v779_v18 = vpop.xlane.xlu0 %778 }
 0x20c   : > { %v825_v20 = vsub.f32 %v2330_v8, %v779_v18  ;;  %1956 = vpow2.f32 %v859_v7 }
 0x20e   : > { %v841_v44 = vmul.f32 1.442695, %v825_v20  ;;  %v803_v43 = vpop.xlane.xlu1 %802 }
 0x20f   : > { %v788_v50 = vpop.xlane.xlu0 %787  ;;  %v833_v51 = vsub.f32 %v2338_v42, %v803_v43 }
 0x210   : > { %1958 = vpow2.f32 %v841_v44  ;;  %v828_v53 = vsub.f32 %v2335_v48, %v788_v50 }
 0x211   : > { %v857_v15 = vmul.f32 1.442695, %v833_v51 }
 0x212   : > { %v847_v59 = vmul.f32 1.442695, %v828_v53  ;;  %v809_v42 = vpop.xlane.xlu1 %808 }
 0x213   : > { %v812_v56 = vpop.xlane.xlu0 %811  ;;  %1960 = vpow2.f32 %v857_v15  ;;  %v835_v1 = vsub.f32 %v2352_v6, %v809_v42 }
 0x214   : > { %v836_v17 = vsub.f32 %v2344_v16, %v812_v56  ;;  %1962 = vpow2.f32 %v847_v59 }
 0x215   : > { %v2399_v58 = vpop.eup %1954  ;;  %v861_v19 = vmul.f32 1.442695, %v835_v1 }
 0x216   : > { %v863_v47 = vmul.f32 1.442695, %v836_v17  ;;  %v876_v8 = vsel %vm776_vm1, %v2399_v58, 0.0  ;;  %v2403_v63 = vpop.eup %1956  ;;  %v791_v4 = vpop.xlane.xlu1 %790 }
 0x217   : > { %v785_v0 = vpop.xlane.xlu0 %784  ;;  %877 = vadd.xlane.f32.xlu0 %v876_v8  ;;  %v900_v3 = vsel %vm776_vm1, %v2403_v63, 0.0  ;;  %v829_v18 = vsub.f32 %v2363_v45, %v791_v4 }
 0x218   : > { %1964 = vpow2.f32 %v863_v47  ;;  %v827_v48 = vsub.f32 %v2350_v55, %v785_v0 }
 0x21a   : > { %v2407_v46 = vpop.eup %1958  ;;  %v845_v16 = vmul.f32 1.442695, %v827_v48  ;;  %v815_v51 = vpop.xlane.xlu1 %814 }
 0x21b   : > { %901 = vadd.xlane.f32.xlu0 %v900_v3  ;;  %v873_v49 = vsel %vm776_vm1, %v2407_v46, 0.0  ;;  %v794_v54 = vpop.xlane.xlu0 %793  ;;  %v837_v15 = vsub.f32 %v2370_v9, %v815_v51 }
 0x21c   : > { %1966 = vpow2.f32 %v845_v16  ;;  %874 = vadd.xlane.f32.xlu1 %v873_v49  ;;  %v830_v60 = vsub.f32 %v2359_v10, %v794_v54  ;;  %v849_v10 = vmul.f32 1.442695, %v829_v18 }
 0x21d   : > { %v2414_v61 = vpop.eup %1960  ;;  %1968 = vpow2.f32 %v861_v19  ;;  %v865_v17 = vmul.f32 1.442695, %v837_v15 }
 0x21e   : > { %v2416_v55 = vpop.eup %1962  ;;  %v851_v6 = vmul.f32 1.442695, %v830_v60  ;;  %v897_v21 = vsel %vm776_vm1, %v2414_v61, 0.0 }
 0x21f   : > { %v882_v7 = vsel %vm776_vm1, %v2416_v55, 0.0  ;;  %v818_v44 = vpop.xlane.xlu0 %817 }
 0x220   : > { %898 = vadd.xlane.f32.xlu1 %v897_v21  ;;  %1970 = vpow2.f32 %v851_v6  ;;  %883 = vadd.xlane.f32.xlu0 %v882_v7  ;;  %v838_v50 = vsub.f32 %v2368_v62, %v818_v44  ;;  %v797_v62 = vpop.xlane.xlu1 %796 }
 0x221   : > { %1972 = vpow2.f32 %v849_v10  ;;  %v831_v42 = vsub.f32 %v2379_v57, %v797_v62 }
 0x222   : > { %v2423_v20 = vpop.eup %1964  ;;  %v867_v59 = vmul.f32 1.442695, %v838_v50 }
 0x223   : > { %v906_v43 = vsel %vm776_vm1, %v2423_v20, 0.0  ;;  %v800_v47 = vpop.xlane.xlu0 %799  ;;  %v853_v16 = vmul.f32 1.442695, %v831_v42 }
 0x224   : > { %907 = vadd.xlane.f32.xlu0 %v906_v43  ;;  %1974 = vpow2.f32 %v867_v59  ;;  %v832_v8 = vsub.f32 %v2377_v52, %v800_v47  ;;  %v821_v49 = vpop.xlane.xlu1 %820  ;;  %v2027_v59 = vmov 0  }
 0x225   : > { %1976 = vpow2.f32 %v865_v17  ;;  %v839_v60 = vsub.f32 %v2389_v5, %v821_v49  ;;  %1828 = vset.pattern.permute.xlu0 %v2027_v59  ;;  %1829 = vset.pattern.permute.xlu1 %v2027_v59 }
 0x226   : > { %v2428_v53 = vpop.eup %1966  ;;  %v855_v48 = vmul.f32 1.442695, %v832_v8 }
 0x227   : > { %v879_v45 = vsel %vm776_vm1, %v2428_v53, 0.0  ;;  %v2433_v56 = vpop.eup %1968  ;;  %v824_v3 = vpop.xlane.xlu0 %823  ;;  %v869_v21 = vmul.f32 1.442695, %v839_v60 }
 0x228   : > { %880 = vadd.xlane.f32.xlu1 %v879_v45  ;;  %v903_v9 = vsel %vm776_vm1, %v2433_v56, 0.0  ;;  %1978 = vpow2.f32 %v855_v48  ;;  %v840_v52 = vsub.f32 %v2385_v2, %v824_v3 }
 0x229   : > { %1980 = vpow2.f32 %v853_v16 }
 0x22a   : > { %v2436_v0 = vpop.eup %1970  ;;  %v871_v54 = vmul.f32 1.442695, %v840_v52 }
 0x22b   : > { %v888_v1 = vsel %vm776_vm1, %v2436_v0, 0.0  ;;  %v2444_v19 = vpop.eup %1972 }
 0x22c   : > { %904 = vadd.xlane.f32.xlu1 %v903_v9  ;;  %889 = vadd.xlane.f32.xlu0 %v888_v1  ;;  %v885_v57 = vsel %vm776_vm1, %v2444_v19, 0.0  ;;  %1982 = vpow2.f32 %v871_v54 }
 0x22d   : > { %1984 = vpow2.f32 %v869_v21 }
 0x22e   : > { %v2449_v6 = vpop.eup %1974 }
 0x22f   : > { %v912_v4 = vsel %vm776_vm1, %v2449_v6, 0.0  ;;  %v2453_v7 = vpop.eup %1976 }
 0x230   : > { %886 = vadd.xlane.f32.xlu1 %v885_v57  ;;  %913 = vadd.xlane.f32.xlu0 %v912_v4  ;;  %v909_v2 = vsel %vm776_vm1, %v2453_v7, 0.0 }
 0x232   : > { %v2457_v18 = vpop.eup %1978 }
 0x233   : > { %v894_v5 = vsel %vm776_vm1, %v2457_v18, 0.0  ;;  %v2461_v10 = vpop.eup %1980 }
 0x234   : > { %910 = vadd.xlane.f32.xlu1 %v909_v2  ;;  %895 = vadd.xlane.f32.xlu0 %v894_v5  ;;  %v891_v44 = vsel %vm776_vm1, %v2461_v10, 0.0 }
 0x236   : > { %v2465_v43 = vpop.eup %1982 }
 0x237   : > { %v918_v50 = vsel %vm776_vm1, %v2465_v43, 0.0  ;;  %v2469_v51 = vpop.eup %1984 }
 0x238   : > { %892 = vadd.xlane.f32.xlu1 %v891_v44  ;;  %919 = vadd.xlane.f32.xlu0 %v918_v50  ;;  %v915_v15 = vsel %vm776_vm1, %v2469_v51, 0.0 }
 0x23c   : > { %916 = vadd.xlane.f32.xlu1 %v915_v15 }
 0x2a4   : > { %v878_v45 = vpop.xlane.xlu0 %877 }
 0x2a5   : > { %1986 = vrcp.f32 %v878_v45 }
 0x2a8   : > { %v902_v17 = vpop.xlane.xlu0 %901 }
 0x2a9   : > { %v875_v47 = vpop.xlane.xlu1 %874  ;;  %1988 = vrcp.f32 %v902_v17 }
 0x2aa   : > { %1990 = vrcp.f32 %v875_v47 }
 0x2ad   : > { %v899_v8 = vpop.xlane.xlu1 %898  ;;  %v884_v62 = vpop.xlane.xlu0 %883 }
 0x2ae   : > { %1992 = vrcp.f32 %v899_v8 }
 0x2af   : > { %v1987_v42 = vpop.eup %1986  ;;  %1994 = vrcp.f32 %v884_v62 }
 0x2b0   : > { %v938_v48 = vmul.f32 %v1987_v42, %v878_v45 }
 0x2b1   : > { %v908_v1 = vpop.xlane.xlu0 %907 }
 0x2b2   : > { %v954_v9 = vsub.f32 2.0, %v938_v48  ;;  %1996 = vrcp.f32 %v908_v1 }
 0x2b3   : > { %v1989_v16 = vpop.eup %1988 }
 0x2b4   : > { %v1991_v3 = vpop.eup %1990  ;;  %v970_v52 = vmul.f32 %v1987_v42, %v954_v9  ;;  %v946_v49 = vmul.f32 %v1989_v16, %v902_v17 }
 0x2b5   : > { %v937_v54 = vmul.f32 %v1991_v3, %v875_v47  ;;  %v881_v57 = vpop.xlane.xlu1 %880 }
 0x2b6   : > { %v986_v60 = vmul.f32 %v2399_v58, %v970_v52  ;;  %v962_v21 = vsub.f32 2.0, %v946_v49  ;;  %1998 = vrcp.f32 %v881_v57 }
 0x2b7   : > { %v953_v4 = vsub.f32 2.0, %v937_v54 }
 0x2b8   : > { %v1993_v2 = vpop.eup %1992  ;;  %1458 = vst.msk [vmem:[%s2481_s15 + $0x8] sm:$0xff] %vm776_vm1, %v986_v60  ;;  %v978_v5 = vmul.f32 %v1989_v16, %v962_v21  ;;  %1031 = vperm.xlu0 %1828, %v986_v60   ;;  %v2028_v16 = vmov 1  }
 0x2b9   : > { %v1995_v44 = vpop.eup %1994  ;;  %v969_v50 = vmul.f32 %v1991_v3, %v953_v4  ;;  %v945_v15 = vmul.f32 %v1993_v2, %v899_v8  ;;  %v905_v45 = vpop.xlane.xlu1 %904 }
 0x2ba   : > { %v994_v17 = vmul.f32 %v2403_v63, %v978_v5  ;;  %v940_v47 = vmul.f32 %v1995_v44, %v884_v62  ;;  %2000 = vrcp.f32 %v905_v45  ;;  %v890_v42 = vpop.xlane.xlu0 %889  ;;  %v2029_v5 = vmov 2  }
 0x2bb   : > { %v961_v58 = vsub.f32 2.0, %v945_v15  ;;  %2002 = vrcp.f32 %v890_v42  ;;  %v2488_v48 = vmul.f32 %v2407_v46, %v969_v50 }
 0x2bc   : > { %1466 = vst.msk [vmem:[%s2481_s15 + $0x48] sm:$0xff] %vm776_vm1, %v994_v17  ;;  %v956_v9 = vsub.f32 2.0, %v940_v47  ;;  %1831 = vset.pattern.permute.xlu0 %v2028_v16  ;;  %1071 = vperm.xlu1 %1829, %v994_v17   ;;  %v1997_v8 = vpop.eup %1996 }
 0x2bd   : > { %v977_v3 = vmul.f32 %v1993_v2, %v961_v58  ;;  %1157 = vperm.xlu0 %1831, %v994_v17   ;;  %1457 = vst.msk [vmem:[%s2481_s15] sm:$0xff] %vm776_vm1, %v2488_v48  ;;  %v948_v62 = vmul.f32 %v1997_v8, %v908_v1  ;;  %v887_v52 = vpop.xlane.xlu1 %886 }
 0x2be   : > { %v972_v63 = vmul.f32 %v1995_v44, %v956_v9  ;;  %2004 = vrcp.f32 %v887_v52  ;;  %v914_v2 = vpop.xlane.xlu0 %913 }
 0x2bf   : > { %v2497_v46 = vmul.f32 %v2414_v61, %v977_v3  ;;  %v964_v21 = vsub.f32 2.0, %v948_v62  ;;  %2006 = vrcp.f32 %v914_v2 }
 0x2c0   : > { %v1999_v49 = vpop.eup %1998  ;;  %v2500_v54 = vmul.f32 %v2416_v55, %v972_v63  ;;  %1830 = vset.pattern.permute.xlu1 %v2028_v16 }
 0x2c1   : > { %v939_v4 = vmul.f32 %v1999_v49, %v881_v57  ;;  %1833 = vset.pattern.permute.xlu0 %v2029_v5  ;;  %1125 = vperm.xlu1 %1830, %v986_v60   ;;  %1465 = vst.msk [vmem:[%s2481_s15 + $0x40] sm:$0xff] %vm776_vm1, %v2497_v46  ;;  %v980_v61 = vmul.f32 %v1997_v8, %v964_v21  ;;  %v911_v1 = vpop.xlane.xlu1 %910 }
 0x2c2   : > { %1460 = vst.msk [vmem:[%s2481_s15 + $0x18] sm:$0xff] %vm776_vm1, %v2500_v54  ;;  %1317 = vperm.xlu0 %1833, %v994_v17   ;;  %2008 = vrcp.f32 %v911_v1  ;;  %v896_v9 = vpop.xlane.xlu0 %895 }
 0x2c3   : > { %v955_v55 = vsub.f32 2.0, %v939_v4  ;;  %v2511_v57 = vmul.f32 %v2423_v20, %v980_v61  ;;  %2010 = vrcp.f32 %v896_v9 }
 0x2c4   : > { %v2001_v44 = vpop.eup %2000 }
 0x2c5   : > { %v2003_v50 = vpop.eup %2002  ;;  %v971_v15 = vmul.f32 %v1999_v49, %v955_v55  ;;  %v947_v47 = vmul.f32 %v2001_v44, %v905_v45  ;;  %1832 = vset.pattern.permute.xlu1 %v2029_v5  ;;  %1468 = vst.msk [vmem:[%s2481_s15 + $0x58] sm:$0xff] %vm776_vm1, %v2511_v57  ;;  %v893_v45 = vpop.xlane.xlu1 %892 }
 0x2c6   : > { %v942_v58 = vmul.f32 %v2003_v50, %v890_v42  ;;  %1835 = vset.pattern.permute.xlu0 %v2028_v16  ;;  %1285 = vperm.xlu1 %1832, %v986_v60   ;;  %2012 = vrcp.f32 %v893_v45  ;;  %v920_v60 = vpop.xlane.xlu0 %919 }
 0x2c7   : > { %v963_v17 = vsub.f32 2.0, %v947_v47  ;;  %1121 = vperm.xlu0 %1835, %v2488_v48   ;;  %v2520_v20 = vmul.f32 %v2428_v53, %v971_v15  ;;  %2014 = vrcp.f32 %v920_v60 }
 0x2c8   : > { %v958_v8 = vsub.f32 2.0, %v942_v58  ;;  %v2005_v3 = vpop.eup %2004 }
 0x2c9   : > { %v979_v63 = vmul.f32 %v2001_v44, %v963_v17  ;;  %1459 = vst.msk [vmem:[%s2481_s15 + $0x10] sm:$0xff] %vm776_vm1, %v2520_v20  ;;  %v941_v62 = vmul.f32 %v2005_v3, %v887_v52  ;;  %v2007_v49 = vpop.eup %2006 }
 0x2ca   : > { %v974_v42 = vmul.f32 %v2003_v50, %v958_v8  ;;  %1834 = vset.pattern.permute.xlu1 %v2027_v59  ;;  %v950_v61 = vmul.f32 %v2007_v49, %v914_v2 }
 0x2cb   : > { %1837 = vset.pattern.permute.xlu0 %v2029_v5  ;;  %1026 = vperm.xlu1 %1834, %v2488_v48   ;;  %v2529_v53 = vmul.f32 %v2433_v56, %v979_v63  ;;  %v957_v4 = vsub.f32 2.0, %v941_v62  ;;  %v917_v56 = vpop.xlane.xlu1 %916 }
 0x2cc   : > { %v2532_v21 = vmul.f32 %v2436_v0, %v974_v42  ;;  %1281 = vperm.xlu0 %1837, %v2488_v48   ;;  %v2009_v52 = vpop.eup %2008  ;;  %v966_v44 = vsub.f32 2.0, %v950_v61  ;;  %2016 = vrcp.f32 %v917_v56 }
 0x2cd   : > { %1467 = vst.msk [vmem:[%s2481_s15 + $0x50] sm:$0xff] %vm776_vm1, %v2529_v53  ;;  %v973_v55 = vmul.f32 %v2005_v3, %v957_v4  ;;  %v949_v50 = vmul.f32 %v2009_v52, %v911_v1  ;;  %v2011_v48 = vpop.eup %2010 }
 0x2ce   : > { %1462 = vst.msk [vmem:[%s2481_s15 + $0x28] sm:$0xff] %vm776_vm1, %v2532_v21  ;;  %v982_v2 = vmul.f32 %v2007_v49, %v966_v44  ;;  %v944_v47 = vmul.f32 %v2011_v48, %v896_v9 }
 0x2cf   : > { %1066 = vperm.xlu1 %1834, %v2497_v46   ;;  %v2543_v0 = vmul.f32 %v2444_v19, %v973_v55  ;;  %v965_v15 = vsub.f32 2.0, %v949_v50 }
 0x2d0   : > { %1840 = vset.pattern.permute.xlu0 %v2028_v16  ;;  %v2013_v1 = vpop.eup %2012  ;;  %v998_v58 = vmul.f32 %v2449_v6, %v982_v2  ;;  %v960_v19 = vsub.f32 2.0, %v944_v47 }
 0x2d1   : > { %1133 = vperm.xlu0 %1840, %v2500_v54   ;;  %1461 = vst.msk [vmem:[%s2481_s15 + $0x20] sm:$0xff] %vm776_vm1, %v2543_v0  ;;  %v981_v17 = vmul.f32 %v2009_v52, %v965_v15  ;;  %v943_v8 = vmul.f32 %v2013_v1, %v893_v45  ;;  %v2015_v63 = vpop.eup %2014 }
 0x2d2   : > { %1470 = vst.msk [vmem:[%s2481_s15 + $0x68] sm:$0xff] %vm776_vm1, %v998_v58  ;;  %v976_v9 = vmul.f32 %v2011_v48, %v960_v19  ;;  %v952_v6 = vmul.f32 %v2015_v63, %v920_v60 }
 0x2d3   : > { %1836 = vset.pattern.permute.xlu1 %v2028_v16  ;;  %v2556_v3 = vmul.f32 %v2453_v7, %v981_v17  ;;  %v959_v42 = vsub.f32 2.0, %v943_v8 }
 0x2d4   : > { %1153 = vperm.xlu1 %1836, %v2497_v46   ;;  %v992_v45 = vmul.f32 %v2457_v18, %v976_v9  ;;  %v968_v4 = vsub.f32 2.0, %v952_v6 }
 0x2d5   : > { %1165 = vperm.xlu0 %1840, %v2511_v57   ;;  %1469 = vst.msk [vmem:[%s2481_s15 + $0x60] sm:$0xff] %vm776_vm1, %v2556_v3  ;;  %v975_v62 = vmul.f32 %v2013_v1, %v959_v42 }
 0x2d6   : > { %v2017_v49 = vpop.eup %2016  ;;  %1464 = vst.msk [vmem:[%s2481_s15 + $0x38] sm:$0xff] %vm776_vm1, %v992_v45  ;;  %v984_v60 = vmul.f32 %v2015_v63, %v968_v4 }
 0x2d7   : > { %v991_v7 = vmul.f32 %v2461_v10, %v975_v62  ;;  %v951_v61 = vmul.f32 %v2017_v49, %v917_v56 }
 0x2d8   : > { %1838 = vset.pattern.permute.xlu1 %v2029_v5  ;;  %v1000_v52 = vmul.f32 %v2465_v43, %v984_v60  ;;  %v2615_v43 = vld [vmem:[%s2790_s2] ss:$0 sm:$0xff] }
 0x2d9   : > { %1313 = vperm.xlu1 %1838, %v2497_v46   ;;  %1841 = vset.pattern.permute.xlu0 %v2029_v5  ;;  %1463 = vst.msk [vmem:[%s2481_s15 + $0x30] sm:$0xff] %vm776_vm1, %v991_v7  ;;  %v967_v18 = vsub.f32 2.0, %v951_v61  ;;  %v1008_v50 = vadd.f32 %v1626_v13, %v2615_v43  ;;  %v1016_v48 = vadd.f32 %v1642_v14, %v2615_v43 }
 0x2da   : > { %1293 = vperm.xlu0 %1841, %v2500_v54   ;;  %1472 = vst.msk [vmem:[%s2481_s15 + $0x78] sm:$0xff] %vm776_vm1, %v1000_v52  ;;  %v1011_v17 = vadd.f32 %v1631_v30, %v2615_v43  ;;  %v1023_v29 = vadd.f32 %v1655_v41, %v2615_v43  ;;  %v1022_v28 = vadd.f32 %v1654_v39, %v2615_v43 }
 0x2db   : > { %v983_v55 = vmul.f32 %v2017_v49, %v967_v18 }
 0x2dd   : > { %1839 = vset.pattern.permute.xlu1 %v2027_v59  ;;  %v999_v10 = vmul.f32 %v2469_v51, %v983_v55  ;;  %v1009_v51 = vadd.f32 %v1627_v24, %v2615_v43 }
 0x2de   : > { %1041 = vperm.xlu1 %1839, %v2500_v54   ;;  %1325 = vperm.xlu0 %1841, %v2511_v57  }
 0x2df   : > { %1471 = vst.msk [vmem:[%s2481_s15 + $0x70] sm:$0xff] %vm776_vm1, %v999_v10 }
 0x2e2   : > { %1842 = vset.pattern.permute.xlu0 %v2027_v59  ;;  %1081 = vperm.xlu1 %1839, %v2511_v57  }
 0x2e3   : > { %1076 = vperm.xlu0 %1842, %v2529_v53  }
 0x2e6   : > { %1036 = vperm.xlu1 %1839, %v2520_v20  }
 0x2e7   : > { %1846 = vset.pattern.permute.xlu0 %v2028_v16 }
 0x2e8   : > { %1141 = vperm.xlu0 %1846, %v2532_v21  }
 0x2ea   : > { %1843 = vset.pattern.permute.xlu1 %v2028_v16 }
 0x2eb   : > { %1129 = vperm.xlu1 %1843, %v2520_v20  }
 0x2ec   : > { %1173 = vperm.xlu0 %1846, %v998_v58  }
 0x2ef   : > { %1161 = vperm.xlu1 %1843, %v2529_v53  }
 0x2f0   : > { %1847 = vset.pattern.permute.xlu0 %v2029_v5 }
 0x2f1   : > { %1301 = vperm.xlu0 %1847, %v2532_v21  }
 0x2f3   : > { %1844 = vset.pattern.permute.xlu1 %v2029_v5 }
 0x2f4   : > { %1289 = vperm.xlu1 %1844, %v2520_v20  }
 0x2f5   : > { %1333 = vperm.xlu0 %1847, %v998_v58  }
 0x2f8   : > { %1321 = vperm.xlu1 %1844, %v2529_v53  }
 0x2f9   : > { %1848 = vset.pattern.permute.xlu0 %v2027_v59 }
 0x2fa   : > { %1086 = vperm.xlu0 %1848, %v2556_v3  }
 0x2fc   : > { %1845 = vset.pattern.permute.xlu1 %v2027_v59 }
 0x2fd   : > { %1051 = vperm.xlu1 %1845, %v2532_v21  }
 0x2fe   : > { %1852 = vset.pattern.permute.xlu0 %v2028_v16 }
 0x2ff   : > { %1149 = vperm.xlu0 %1852, %v992_v45  }
 0x301   : > { %1091 = vperm.xlu1 %1845, %v998_v58  }
 0x303   : > { %1181 = vperm.xlu0 %1852, %v1000_v52  }
 0x305   : > { %1046 = vperm.xlu1 %1845, %v2543_v0  }
 0x307   : > { %1853 = vset.pattern.permute.xlu0 %v2029_v5 }
 0x308   : > { %1309 = vperm.xlu0 %1853, %v992_v45  }
 0x309   : > { %1849 = vset.pattern.permute.xlu1 %v2028_v16 }
 0x30a   : > { %1137 = vperm.xlu1 %1849, %v2543_v0  }
 0x30c   : > { %1341 = vperm.xlu0 %1853, %v1000_v52  }
 0x30e   : > { %1169 = vperm.xlu1 %1849, %v2556_v3  }
 0x310   : > { %1854 = vset.pattern.permute.xlu0 %v2027_v59 }
 0x311   : > { %1096 = vperm.xlu0 %1854, %v999_v10  }
 0x312   : > { %1850 = vset.pattern.permute.xlu1 %v2029_v5 }
 0x313   : > { %1297 = vperm.xlu1 %1850, %v2543_v0  }
 0x315   : > { %1857 = vset.pattern.permute.xlu0 %v2029_v5 }
 0x317   : > { %1329 = vperm.xlu1 %1850, %v2556_v3   ;;  %v1019_v3 = vadd.f32 %v1647_v31, %v2615_v43  ;;  %v1018_v31 = vadd.f32 %v1646_v27, %v2615_v43 }
 0x31b   : > { %1851 = vset.pattern.permute.xlu1 %v2027_v59 }
 0x31c   : > { %1061 = vperm.xlu1 %1851, %v992_v45  }
 0x320   : > { %1101 = vperm.xlu1 %1851, %v1000_v52   ;;  %v1010_v52 = vadd.f32 %v1630_v26, %v2615_v43 }
 0x324   : > { %1056 = vperm.xlu1 %1851, %v991_v7  }
 0x328   : > { %1855 = vset.pattern.permute.xlu1 %v2028_v16  ;;  %v1017_v16 = vadd.f32 %v1643_v25, %v2615_v43 }
 0x329   : > { %1145 = vperm.xlu1 %1855, %v991_v7  }
 0x32d   : > { %1177 = vperm.xlu1 %1855, %v999_v10  }
 0x331   : > { %1856 = vset.pattern.permute.xlu1 %v2029_v5 }
 0x332   : > { %1305 = vperm.xlu1 %1856, %v991_v7  }
 0x336   : > { %1337 = vperm.xlu1 %1856, %v999_v10   ;;  %v1013_v10 = vadd.f32 %v1635_v36, %v2615_v43 }
 0x337   : > { %v1032_v59 = vpop.permute.xlu0 %1031 }
 0x338   : > { %v2621_v46 = vmul.f32 %v1032_v59, %v1009_v51 }
 0x33b   : > { %v1072_v54 = vpop.permute.xlu1 %1071 }
 0x33c   : > { %v2626_v57 = vmul.f32 %v1072_v54, %v1017_v16  ;;  %v1158_v20 = vpop.permute.xlu0 %1157 }
 0x33d   : > { %v1193_v56 = vmul.f32 %v1158_v20, %v1017_v16 }
 0x340   : > { %v1126_v53 = vpop.permute.xlu1 %1125 }
 0x341   : > { %v1185_v21 = vmul.f32 %v1126_v53, %v1009_v51  ;;  %v1318_v5 = vpop.permute.xlu0 %1317 }
 0x342   : > { %v1353_v47 = vmul.f32 %v1318_v5, %v1017_v16  ;;  %v1021_v16 = vadd.f32 %v1651_v37, %v2615_v43 }
 0x343   : > { %1218 = vrot.lane.b32.xlu1 %v1185_v21, %s2030_s18 }
 0x345   : > { %v1286_v24 = vpop.permute.xlu1 %1285 }
 0x346   : > { %v1122_v44 = vpop.permute.xlu0 %1121  ;;  %v1345_v25 = vmul.f32 %v1286_v24, %v1009_v51 }
 0x347   : > { %1234 = vrot.lane.b32.xlu1 %v1193_v56, %s2030_s18  ;;  %v1184_v13 = vmul.f32 %v1122_v44, %v1008_v50 }
 0x34a   : > { %v1027_v0 = vpop.permute.xlu1 %1026 }
 0x34b   : > { %v2636_v2 = vmul.f32 %v1027_v0, %v1008_v50  ;;  %1378 = vrot.lane.b32.xlu1 %v1345_v25, %s2031_s19  ;;  %v1282_v15 = vpop.permute.xlu0 %1281 }
 0x34c   : > { %v1344_v63 = vmul.f32 %v1282_v15, %v1008_v50  ;;  %v1020_v50 = vadd.f32 %v1650_v33, %v2615_v43 }
 0x34e   : > { %v1067_v1 = vpop.permute.xlu1 %1066 }
 0x34f   : > { %v2639_v58 = vmul.f32 %v1067_v1, %v1016_v48  ;;  %1394 = vrot.lane.b32.xlu1 %v1353_v47, %s2031_s19  ;;  %v1015_v47 = vadd.f32 %v1639_v40, %v2615_v43 }
 0x350   : > { %v1134_v11 = vpop.permute.xlu0 %1133 }
 0x351   : > { %v1187_v8 = vmul.f32 %v1134_v11, %v1011_v17 }
 0x353   : > { %v1154_v12 = vpop.permute.xlu1 %1153  ;;  %1216 = vrot.lane.b32.xlu1 %v1184_v13, %s2030_s18 }
 0x354   : > { %v1192_v14 = vmul.f32 %v1154_v12, %v1016_v48  ;;  %v1166_v19 = vpop.permute.xlu0 %1165 }
 0x355   : > { %v1195_v42 = vmul.f32 %v1166_v19, %v1019_v3 }
 0x356   : > { %1232 = vrot.lane.b32.xlu0 %v1192_v14, %s2030_s18  ;;  %v1012_v14 = vadd.f32 %v1634_v32, %v2615_v43 }
 0x357   : > { %1222 = vrot.lane.b32.xlu1 %v1187_v8, %s2030_s18 }
 0x358   : > { %v1314_v9 = vpop.permute.xlu1 %1313 }
 0x359   : > { %v1294_v6 = vpop.permute.xlu0 %1293  ;;  %v1352_v30 = vmul.f32 %v1314_v9, %v1016_v48 }
 0x35a   : > { %1376 = vrot.lane.b32.xlu0 %v1344_v63, %s2031_s19  ;;  %v1347_v45 = vmul.f32 %v1294_v6, %v1011_v17 }
 0x35b   : > { %1238 = vrot.lane.b32.xlu1 %v1195_v42, %s2030_s18 }
 0x35d   : > { %v1042_v62 = vpop.permute.xlu1 %1041  ;;  %v1326_v49 = vpop.permute.xlu0 %1325 }
 0x35e   : > { %v2653_v4 = vmul.f32 %v1042_v62, %v1011_v17  ;;  %1392 = vrot.lane.b32.xlu0 %v1352_v30, %s2031_s19  ;;  %v1355_v7 = vmul.f32 %v1326_v49, %v1019_v3 }
 0x35f   : > { %1382 = vrot.lane.b32.xlu1 %v1347_v45, %s2031_s19 }
 0x361   : > { %v1082_v61 = vpop.permute.xlu1 %1081 }
 0x362   : > { %v2660_v60 = vmul.f32 %v1082_v61, %v1019_v3  ;;  %v1077_v18 = vpop.permute.xlu0 %1076 }
 0x363   : > { %v2665_v55 = vmul.f32 %v1077_v18, %v1018_v31  ;;  %1398 = vrot.lane.b32.xlu1 %v1355_v7, %s2031_s19 }
 0x365   : > { %v1037_v51 = vpop.permute.xlu1 %1036 }
 0x366   : > { %v2671_v23 = vmul.f32 %v1037_v51, %v1010_v52  ;;  %v1014_v51 = vadd.f32 %v1638_v38, %v2615_v43 }
 0x367   : > { %v1142_v27 = vpop.permute.xlu0 %1141 }
 0x368   : > { %v1189_v59 = vmul.f32 %v1142_v27, %v1013_v10 }
 0x36a   : > { %v1130_v54 = vpop.permute.xlu1 %1129  ;;  %1226 = vrot.lane.b32.xlu1 %v1189_v59, %s2030_s18 }
 0x36b   : > { %v1186_v22 = vmul.f32 %v1130_v54, %v1010_v52  ;;  %v1174_v26 = vpop.permute.xlu0 %1173 }
 0x36c   : > { %v1197_v20 = vmul.f32 %v1174_v26, %v1021_v16 }
 0x36d   : > { %1220 = vrot.lane.b32.xlu0 %v1186_v22, %s2030_s18 }
 0x36e   : > { %v1162_v53 = vpop.permute.xlu1 %1161  ;;  %1242 = vrot.lane.b32.xlu1 %v1197_v20, %s2030_s18 }
 0x36f   : > { %v1194_v36 = vmul.f32 %v1162_v53, %v1018_v31 }
 0x370   : > { %v1302_v21 = vpop.permute.xlu0 %1301 }
 0x371   : > { %v1349_v5 = vmul.f32 %v1302_v21, %v1013_v10  ;;  %1236 = vrot.lane.b32.xlu0 %v1194_v36, %s2030_s18 }
 0x373   : > { %v1290_v56 = vpop.permute.xlu1 %1289  ;;  %1386 = vrot.lane.b32.xlu1 %v1349_v5, %s2031_s19 }
 0x374   : > { %v1346_v37 = vmul.f32 %v1290_v56, %v1010_v52  ;;  %v1334_v24 = vpop.permute.xlu0 %1333 }
 0x375   : > { %v1357_v44 = vmul.f32 %v1334_v24, %v1021_v16 }
 0x376   : > { %1380 = vrot.lane.b32.xlu0 %v1346_v37, %s2031_s19 }
 0x377   : > { %v1322_v25 = vpop.permute.xlu1 %1321  ;;  %1402 = vrot.lane.b32.xlu1 %v1357_v44, %s2031_s19 }
 0x378   : > { %v1354_v0 = vmul.f32 %v1322_v25, %v1018_v31 }
 0x379   : > { %v1087_v48 = vpop.permute.xlu0 %1086 }
 0x37a   : > { %v2686_v15 = vmul.f32 %v1087_v48, %v1020_v50  ;;  %1396 = vrot.lane.b32.xlu0 %v1354_v0, %s2031_s19 }
 0x37c   : > { %v1052_v1 = vpop.permute.xlu1 %1051 }
 0x37d   : > { %v2692_v11 = vmul.f32 %v1052_v1, %v1013_v10 }
 0x37e   : > { %v1150_v13 = vpop.permute.xlu0 %1149 }
 0x37f   : > { %v1191_v17 = vmul.f32 %v1150_v13, %v1015_v47 }
 0x380   : > { %v1092_v33 = vpop.permute.xlu1 %1091 }
 0x381   : > { %v2697_v12 = vmul.f32 %v1092_v33, %v1021_v16  ;;  %1230 = vrot.lane.b32.xlu1 %v1191_v17, %s2030_s18 }
 0x382   : > { %v1182_v19 = vpop.permute.xlu0 %1181 }
 0x383   : > { %v1199_v40 = vmul.f32 %v1182_v19, %v1023_v29 }
 0x384   : > { %v1047_v8 = vpop.permute.xlu1 %1046 }
 0x385   : > { %v2703_v3 = vmul.f32 %v1047_v8, %v1012_v14  ;;  %1246 = vrot.lane.b32.xlu1 %v1199_v40, %s2030_s18 }
 0x387   : > { %v1310_v63 = vpop.permute.xlu0 %1309 }
 0x388   : > { %v1351_v9 = vmul.f32 %v1310_v63, %v1015_v47 }
 0x389   : > { %v1138_v42 = vpop.permute.xlu1 %1137 }
 0x38a   : > { %v1188_v41 = vmul.f32 %v1138_v42, %v1012_v14  ;;  %1390 = vrot.lane.b32.xlu1 %v1351_v9, %s2031_s19 }
 0x38b   : > { %v1342_v6 = vpop.permute.xlu0 %1341 }
 0x38c   : > { %v1359_v30 = vmul.f32 %v1342_v6, %v1023_v29  ;;  %1224 = vrot.lane.b32.xlu0 %v1188_v41, %s2030_s18 }
 0x38d   : > { %v1170_v45 = vpop.permute.xlu1 %1169 }
 0x38e   : > { %v1196_v32 = vmul.f32 %v1170_v45, %v1020_v50  ;;  %1406 = vrot.lane.b32.xlu1 %v1359_v30, %s2031_s19 }
 0x390   : > { %1240 = vrot.lane.b32.xlu0 %v1196_v32, %s2030_s18  ;;  %v1097_v62 = vpop.permute.xlu0 %1096 }
 0x391   : > { %v2713_v49 = vmul.f32 %v1097_v62, %v1022_v28 }
 0x392   : > { %v1298_v31 = vpop.permute.xlu1 %1297 }
 0x393   : > { %v1348_v7 = vmul.f32 %v1298_v31, %v1012_v14 }
 0x395   : > { %1384 = vrot.lane.b32.xlu0 %v1348_v7, %s2031_s19 }
 0x396   : > { %v1330_v61 = vpop.permute.xlu1 %1329 }
 0x397   : > { %v1356_v18 = vmul.f32 %v1330_v61, %v1020_v50 }
 0x399   : > { %1400 = vrot.lane.b32.xlu0 %v1356_v18, %s2031_s19 }
 0x39b   : > { %v1062_v52 = vpop.permute.xlu1 %1061 }
 0x39c   : > { %v2717_v10 = vmul.f32 %v1062_v52, %v1015_v47 }
 0x39f   : > { %v1102_v35 = vpop.permute.xlu1 %1101 }
 0x3a0   : > { %v2719_v39 = vmul.f32 %v1102_v35, %v1023_v29 }
 0x3a3   : > { %v1057_v27 = vpop.permute.xlu1 %1056 }
 0x3a4   : > { %v2724_v59 = vmul.f32 %v1057_v27, %v1014_v51 }
 0x3a8   : > { %v1146_v16 = vpop.permute.xlu1 %1145 }
 0x3a9   : > { %v1190_v54 = vmul.f32 %v1146_v16, %v1014_v51 }
 0x3ab   : > { %1228 = vrot.lane.b32.xlu0 %v1190_v54, %s2030_s18 }
 0x3ac   : > { %v1178_v22 = vpop.permute.xlu1 %1177 }
 0x3ad   : > { %v1198_v26 = vmul.f32 %v1178_v22, %v1022_v28 }
 0x3af   : > { %1244 = vrot.lane.b32.xlu0 %v1198_v26, %s2030_s18 }
 0x3b1   : > { %v1306_v20 = vpop.permute.xlu1 %1305 }
 0x3b2   : > { %v1350_v53 = vmul.f32 %v1306_v20, %v1014_v51 }
 0x3b4   : > { %1388 = vrot.lane.b32.xlu0 %v1350_v53, %s2031_s19 }
 0x3b5   : > { %v1338_v36 = vpop.permute.xlu1 %1337 }
 0x3b6   : > { %v1358_v21 = vmul.f32 %v1338_v36, %v1022_v28 }
 0x3b8   : > { %1404 = vrot.lane.b32.xlu0 %v1358_v21, %s2031_s19 }
 0x3b9   : > { %v1219_v34 = vpop.permute.xlu1 %1218 }
 0x3ba   : > { %v1265_v43 = vadd.f32 %v1219_v34, %v2621_v46 }
 0x3bd   : > { %v1235_v38 = vpop.permute.xlu1 %1234 }
 0x3be   : > { %v1273_v37 = vadd.f32 %v1235_v38, %v2626_v57 }
 0x3c1   : > { %v1379_v5 = vpop.permute.xlu1 %1378 }
 0x3c2   : > { %v1425_v56 = vadd.f32 %v1379_v5, %v1265_v43 }
 0x3c4   : > { %1442 = vst.msk [vmem:[%s2736_s23 + $0x8] sm:$0xff] %vm1440_vm2, %v1425_v56 }
 0x3c5   : > { %v1395_v24 = vpop.permute.xlu1 %1394 }
 0x3c6   : > { %v1433_v44 = vadd.f32 %v1395_v24, %v1273_v37 }
 0x3c8   : > { %1450 = vst.msk [vmem:[%s2736_s23 + $0x48] sm:$0xff] %vm1440_vm2, %v1433_v44  ;;  %v1233_v46 = vpop.permute.xlu0 %1232 }
 0x3c9   : > { %v1217_v50 = vpop.permute.xlu1 %1216  ;;  %v1272_v1 = vadd.f32 %v1233_v46, %v2639_v58 }
 0x3ca   : > { %v1264_v25 = vadd.f32 %v1217_v50, %v2636_v2 }
 0x3cc   : > { %v1377_v0 = vpop.permute.xlu0 %1376 }
 0x3cd   : > { %v1424_v48 = vadd.f32 %v1377_v0, %v1264_v25  ;;  %v1223_v47 = vpop.permute.xlu1 %1222 }
 0x3ce   : > { %v1267_v29 = vadd.f32 %v1223_v47, %v2653_v4 }
 0x3cf   : > { %1441 = vst.msk [vmem:[%s2736_s23] sm:$0xff] %vm1440_vm2, %v1424_v48 }
 0x3d0   : > { %v1393_v57 = vpop.permute.xlu0 %1392 }
 0x3d1   : > { %v1432_v13 = vadd.f32 %v1393_v57, %v1272_v1  ;;  %v1239_v17 = vpop.permute.xlu1 %1238 }
 0x3d2   : > { %v1275_v2 = vadd.f32 %v1239_v17, %v2660_v60 }
 0x3d3   : > { %1449 = vst.msk [vmem:[%s2736_s23 + $0x40] sm:$0xff] %vm1440_vm2, %v1432_v13 }
 0x3d5   : > { %v1383_v33 = vpop.permute.xlu1 %1382 }
 0x3d6   : > { %v1427_v14 = vadd.f32 %v1383_v33, %v1267_v29 }
 0x3d8   : > { %1444 = vst.msk [vmem:[%s2736_s23 + $0x18] sm:$0xff] %vm1440_vm2, %v1427_v14 }
 0x3d9   : > { %v1399_v19 = vpop.permute.xlu1 %1398 }
 0x3da   : > { %v1435_v40 = vadd.f32 %v1399_v19, %v1275_v2 }
 0x3dc   : > { %1452 = vst.msk [vmem:[%s2736_s23 + $0x58] sm:$0xff] %vm1440_vm2, %v1435_v40 }
 0x3dd   : > { %v1227_v58 = vpop.permute.xlu1 %1226 }
 0x3de   : > { %v1269_v4 = vadd.f32 %v1227_v58, %v2692_v11 }
 0x3df   : > { %v1221_v8 = vpop.permute.xlu0 %1220 }
 0x3e0   : > { %v1266_v6 = vadd.f32 %v1221_v8, %v2671_v23 }
 0x3e1   : > { %v1243_v63 = vpop.permute.xlu1 %1242 }
 0x3e2   : > { %v1277_v60 = vadd.f32 %v1243_v63, %v2697_v12 }
 0x3e3   : > { %v1237_v9 = vpop.permute.xlu0 %1236 }
 0x3e4   : > { %v1274_v62 = vadd.f32 %v1237_v9, %v2665_v55 }
 0x3e5   : > { %v1387_v42 = vpop.permute.xlu1 %1386 }
 0x3e6   : > { %v1429_v41 = vadd.f32 %v1387_v42, %v1269_v4 }
 0x3e8   : > { %1446 = vst.msk [vmem:[%s2736_s23 + $0x28] sm:$0xff] %vm1440_vm2, %v1429_v41  ;;  %v1381_v30 = vpop.permute.xlu0 %1380 }
 0x3e9   : > { %v1426_v45 = vadd.f32 %v1381_v30, %v1266_v6  ;;  %v1403_v28 = vpop.permute.xlu1 %1402 }
 0x3ea   : > { %v1437_v32 = vadd.f32 %v1403_v28, %v1277_v60 }
 0x3eb   : > { %1443 = vst.msk [vmem:[%s2736_s23 + $0x10] sm:$0xff] %vm1440_vm2, %v1426_v45 }
 0x3ec   : > { %1454 = vst.msk [vmem:[%s2736_s23 + $0x68] sm:$0xff] %vm1440_vm2, %v1437_v32  ;;  %v1397_v11 = vpop.permute.xlu0 %1396 }
 0x3ed   : > { %v1434_v31 = vadd.f32 %v1397_v11, %v1274_v62 }
 0x3ef   : > { %1451 = vst.msk [vmem:[%s2736_s23 + $0x50] sm:$0xff] %vm1440_vm2, %v1434_v31 }
 0x3f3   : > { %v1231_v23 = vpop.permute.xlu1 %1230 }
 0x3f4   : > { %v1271_v7 = vadd.f32 %v1231_v23, %v2717_v10 }
 0x3f7   : > { %v1247_v12 = vpop.permute.xlu1 %1246 }
 0x3f8   : > { %v1279_v55 = vadd.f32 %v1247_v12, %v2719_v39 }
 0x3fc   : > { %v1391_v61 = vpop.permute.xlu1 %1390 }
 0x3fd   : > { %v1431_v18 = vadd.f32 %v1391_v61, %v1271_v7 }
 0x3fe   : > { %v1225_v52 = vpop.permute.xlu0 %1224 }
 0x3ff   : > { %1448 = vst.msk [vmem:[%s2736_s23 + $0x38] sm:$0xff] %vm1440_vm2, %v1431_v18  ;;  %v1268_v16 = vadd.f32 %v1225_v52, %v2703_v3 }
 0x400   : > { %v1407_v35 = vpop.permute.xlu1 %1406 }
 0x401   : > { %v1439_v51 = vadd.f32 %v1407_v35, %v1279_v55 }
 0x402   : > { %v1241_v27 = vpop.permute.xlu0 %1240 }
 0x403   : > { %1456 = vst.msk [vmem:[%s2736_s23 + $0x78] sm:$0xff] %vm1440_vm2, %v1439_v51  ;;  %v1276_v10 = vadd.f32 %v1241_v27, %v2686_v15 }
 0x407   : > { %v1385_v54 = vpop.permute.xlu0 %1384 }
 0x408   : > { %v1428_v22 = vadd.f32 %v1385_v54, %v1268_v16 }
 0x40a   : > { %1445 = vst.msk [vmem:[%s2736_s23 + $0x20] sm:$0xff] %vm1440_vm2, %v1428_v22 }
 0x40b   : > { %v1401_v26 = vpop.permute.xlu0 %1400 }
 0x40c   : > { %v1436_v20 = vadd.f32 %v1401_v26, %v1276_v10 }
 0x40e   : > { %1453 = vst.msk [vmem:[%s2736_s23 + $0x60] sm:$0xff] %vm1440_vm2, %v1436_v20 }
 0x41d   : > { %v1229_v39 = vpop.permute.xlu0 %1228 }
 0x41e   : > { %v1270_v36 = vadd.f32 %v1229_v39, %v2724_v59 }
 0x421   : > { %v1245_v53 = vpop.permute.xlu0 %1244 }
 0x422   : > { %v1278_v38 = vadd.f32 %v1245_v53, %v2713_v49 }
 0x426   : > { %v1389_v21 = vpop.permute.xlu0 %1388 }
 0x427   : > { %v1430_v34 = vadd.f32 %v1389_v21, %v1270_v36 }
 0x429   : > { %1447 = vst.msk [vmem:[%s2736_s23 + $0x30] sm:$0xff] %vm1440_vm2, %v1430_v34 }
 0x42a   : > { %v1405_v3 = vpop.permute.xlu0 %1404 }
 0x42b   : > { %v1438_v43 = vadd.f32 %v1405_v3, %v1278_v38 }
 0x42d   : > { %1455 = vst.msk [vmem:[%s2736_s23 + $0x70] sm:$0xff] %vm1440_vm2, %v1438_v43 }
 0x42e PF: > { %s17_s21 = sadd.s32 1, %s2024_s21  }
 0x42f   : > { %p14_p4 = scmp.ge.s32.totalorder %s17_s21, 4  }
 0x431   :  { %16 = sbr.rel (!%p14_p4) target bundleno = 1 (0x1), region = 85 }

</bundles_post_ra>
